<compile_context>
chip_gen: v6e
topology: v6e:2x2x1
jax: 0.10.0
libtpu: 0.0.40
codegen_flags: <defaults>
</compile_context>

<pallas_src>
import functools

import jax
import jax.numpy as jnp
from jax.experimental import pallas as pl
from jax.experimental.pallas import tpu as pltpu

# 32 MiB is inside the default scoped-VMEM budget on v5e/v6e/v7x and is huge
# headroom for these tiles.  For production E/Hd: raise toward 64-100 MiB on
# v5e/v6e, keep <= ~48 MiB on v7x (64 MiB physical), and single-buffer the
# constant-index weight blocks (pipeline_mode=pl.Buffered(1)) / keep them bf16.
_VMEM_LIMIT = 32 * 1024 * 1024


# ----------------------------- in-kernel helpers -----------------------------

def _erf(x):
    # Abramowitz & Stegun 7.1.26 (max abs error ~1.5e-7): only mul/add/exp,
    # exp rides the otherwise-idle EUP slot.
    a1, a2, a3, a4, a5 = 0.254829592, -0.284496736, 1.421413741, -1.453152027, 1.061405429
    p = 0.3275911
    ax = jnp.abs(x)
    t = 1.0 / (1.0 + p * ax)
    poly = ((((a5 * t + a4) * t + a3) * t + a2) * t + a1) * t
    y = 1.0 - poly * jnp.exp(-ax * ax)
    return jnp.where(x >= 0, y, -y)


def _gelu_exact(x):
    # Matches torch.nn.GELU() (erf-based) to ~1e-7.
    return 0.5 * x * (1.0 + _erf(x * 0.7071067811865476))


def _layernorm(x, gamma, beta, eps=1e-5):
    mu = jnp.mean(x, axis=-1, keepdims=True)
    xc = x - mu
    var = jnp.mean(xc * xc, axis=-1, keepdims=True)
    return xc * jax.lax.rsqrt(var + eps) * gamma + beta


# ------------------------------ fused kernel ----------------------------------

def _encoder_kernel(x_ref, srel_ref, wqkv_ref, go_ref, bo_ref, g1_ref, b1_ref,
                    w1_ref, fb1_ref, w2_ref, fb2_ref, g2_ref, b2_ref,
                    o_ref, attn_scr, *, num_heads, head_dim, scale, mxu_dtype):
    """One batch element: QKV -> rel. attention -> to_out LN -> norm1 -> FFN -> norm2."""
    H, dh = num_heads, head_dim
    E = H * dh

    x = x_ref[0]                                                     # [L, E] f32

    # Fused QKV projection (bf16 MXU operands, f32 accumulate).
    qkv = jnp.dot(x.astype(mxu_dtype), wqkv_ref[...],
                  preferred_element_type=jnp.float32)                # [L, 3E]

    # Per-head attention (static unroll, H small).  Scores/P@V stay f32: they
    # are VMEM-resident and MXU-starved (K=dh=8), so bf16 buys nothing here.
    for h in range(H):
        q_h = qkv[:, h * dh:(h + 1) * dh]                            # [L, dh]
        k_h = qkv[:, E + h * dh:E + (h + 1) * dh]
        v_h = qkv[:, 2 * E + h * dh:2 * E + (h + 1) * dh]
        s = jax.lax.dot_general(q_h, k_h, (((1,), (1,)), ((), ())),
                                preferred_element_type=jnp.float32)  # [L, L]
        s = (s + srel_ref[0, h]) * scale
        s = s - jnp.max(s, axis=-1, keepdims=True)
        p = jnp.exp(s)
        p = p * pl.reciprocal(jnp.sum(p, axis=-1, keepdims=True), approx=True)
        attn_scr[:, h * dh:(h + 1) * dh] = jnp.dot(
            p, v_h, preferred_element_type=jnp.float32)              # merged heads

    t = _layernorm(attn_scr[...], go_ref[...], bo_ref[...])          # attn.to_out
    y1 = _layernorm(x + t, g1_ref[...], b1_ref[...])                 # norm1

    hmid = jnp.dot(y1.astype(mxu_dtype), w1_ref[...],
                   preferred_element_type=jnp.float32) + fb1_ref[...]
    hmid = _gelu_exact(hmid)
    z = jnp.dot(hmid.astype(mxu_dtype), w2_ref[...],
                preferred_element_type=jnp.float32) + fb2_ref[...]

    o_ref[0] = _layernorm(y1 + z, g2_ref[...], b2_ref[...]).astype(o_ref.dtype)


# --------------------------------- wrapper ------------------------------------

@functools.partial(jax.jit, static_argnames=("num_heads", "mxu_dtype"))
def transformer_encoder_forward(x, p, *, num_heads, mxu_dtype=jnp.bfloat16):
    """x: [B, L, E] float32.  p: dict of parameters (torch layout)."""
    B, L, E = x.shape
    H = num_heads
    dh = E // H
    Hd = p['w1'].shape[0]
    f32 = jnp.float32
    hp = jax.lax.Precision.HIGHEST

    # ---- weight prep (all under jit; tiny, fused by XLA) ---------------------
    wqkv_t = jnp.concatenate([p['wq'].T, p['wk'].T, p['wv'].T], axis=1).astype(mxu_dtype)
    w1_t = p['w1'].T.astype(mxu_dtype)                               # [E, Hd]
    w2_t = p['w2'].T.astype(mxu_dtype)                               # [Hd, E]

    # ---- relative-position bias Srel (XLA glue; see TODO above) --------------
    # Fold Wq^T and Er^T so QEr for all heads is ONE lane-dense [N, H*L] matmul.
    wq_t = p['wq'].T                                                 # [E, E]
    w_qer = jnp.einsum('ehd,ld->ehl', wq_t.reshape(E, H, dh), p['er'],
                       precision=hp).reshape(E, H * L)               # [E, H*L]
    qer = jnp.dot(x.reshape(B * L, E), w_qer, precision=hp)          # [N, H*L]
    qer = qer.reshape(B, L, H, L).transpose(0, 2, 1, 3)              # [B,H,L,L]
    padded = jnp.pad(qer, ((0, 0), (0, 0), (0, 0), (1, 0)))          # F.pad(.,(1,0))
    srel = padded.reshape(B, H, L + 1, L)[:, :, 1:, :]               # skew()

    def vec(v_):  # [C] -> [1, C] for clean 2D VMEM blocks
        return v_.reshape(1, -1)

    kernel = functools.partial(_encoder_kernel, num_heads=H, head_dim=dh,
                               scale=float(E) ** (-0.5), mxu_dtype=mxu_dtype)

    out = pl.pallas_call(
        kernel,
        out_shape=jax.ShapeDtypeStruct((B, L, E), f32),
        grid_spec=pltpu.PrefetchScalarGridSpec(
            num_scalar_prefetch=0,
            grid=(B,),
            in_specs=[
                pl.BlockSpec((1, L, E), lambda b: (b, 0, 0)),        # x
                pl.BlockSpec((1, H, L, L), lambda b: (b, 0, 0, 0)),  # srel
                pl.BlockSpec((E, 3 * E), lambda b: (0, 0)),          # [Wq|Wk|Wv]^T
                pl.BlockSpec((1, E), lambda b: (0, 0)),              # to_out gamma
                pl.BlockSpec((1, E), lambda b: (0, 0)),              # to_out beta
                pl.BlockSpec((1, E), lambda b: (0, 0)),              # norm1 gamma
                pl.BlockSpec((1, E), lambda b: (0, 0)),              # norm1 beta
                pl.BlockSpec((E, Hd), lambda b: (0, 0)),             # fc1 W^T
                pl.BlockSpec((1, Hd), lambda b: (0, 0)),             # fc1 b
                pl.BlockSpec((Hd, E), lambda b: (0, 0)),             # fc2 W^T
                pl.BlockSpec((1, E), lambda b: (0, 0)),              # fc2 b
                pl.BlockSpec((1, E), lambda b: (0, 0)),              # norm2 gamma
                pl.BlockSpec((1, E), lambda b: (0, 0)),              # norm2 beta
            ],
            out_specs=pl.BlockSpec((1, L, E), lambda b: (b, 0, 0)),
            scratch_shapes=[pltpu.VMEM((L, E), jnp.float32)]),       # merged heads
        compiler_params=pltpu.CompilerParams(
            dimension_semantics=("parallel",), vmem_limit_bytes=_VMEM_LIMIT),
    )(x, srel, wqkv_t,
      vec(p['ln_out_g']), vec(p['ln_out_b']),
      vec(p['ln1_g']), vec(p['ln1_b']),
      w1_t, vec(p['b1']), w2_t, vec(p['b2']),
      vec(p['ln2_g']), vec(p['ln2_b']))
    return out


# ------------------------------ pure-JAX reference -----------------------------

def reference_forward(x, p, *, num_heads):
    B, L, E = x.shape
    H = num_heads
    dh = E // H
    hp = jax.lax.Precision.HIGHEST

    def ln(v, g, b, eps=1e-5):
        mu = jnp.mean(v, axis=-1, keepdims=True)
        var = jnp.mean((v - mu) ** 2, axis=-1, keepdims=True)
        return (v - mu) / jnp.sqrt(var + eps) * g + b

    q = jnp.einsum('ble,fe->blf', x, p['wq'], precision=hp)
    k = jnp.einsum('ble,fe->blf', x, p['wk'], precision=hp)
    v = jnp.einsum('ble,fe->blf', x, p['wv'], precision=hp)
    q = q.reshape(B, L, H, dh).transpose(0, 2, 1, 3)                 # [B,H,L,dh]
    kT = k.reshape(B, L, H, dh).transpose(0, 2, 3, 1)                # [B,H,dh,L]
    v = v.reshape(B, L, H, dh).transpose(0, 2, 1, 3)

    qer = jnp.einsum('bhld,md->bhlm', q, p['er'], precision=hp)      # [B,H,L,L]
    padded = jnp.pad(qer, ((0, 0), (0, 0), (0, 0), (1, 0)))
    srel = padded.reshape(B, H, L + 1, L)[:, :, 1:, :]

    attn = jnp.einsum('bhld,bhdm->bhlm', q, kT, precision=hp)
    attn = (attn + srel) * (float(E) ** -0.5)
    attn = jax.nn.softmax(attn, axis=-1)
    out = jnp.einsum('bhlm,bhmd->bhld', attn, v, precision=hp)
    out = out.transpose(0, 2, 1, 3).reshape(B, L, E)
    out = ln(out, p['ln_out_g'], p['ln_out_b'])                      # attn.to_out

    x1 = ln(x + out, p['ln1_g'], p['ln1_b'])                         # norm1
    h = jnp.einsum('ble,fe->blf', x1, p['w1'], precision=hp) + p['b1']
    h = jax.nn.gelu(h, approximate=False)
    z = jnp.einsum('blf,ef->ble', h, p['w2'], precision=hp) + p['b2']
    return ln(x1 + z, p['ln2_g'], p['ln2_b'])                        # norm2


# ----------------------------------- main --------------------------------------

if __name__ == "__main__":
    # Attention_Rel_Vec hard-codes seq_len=44, so L must be 44.
    B, L, E, H = 2, 44, 32, 4
    MLP_RATIO = 4.0
    Hd = int(E * MLP_RATIO)
    dh = E // H

    key = jax.random.PRNGKey(0)
    ks = jax.random.split(key, 16)

    def rn(k, shape, s=1.0):
        return s * jax.random.normal(k, shape, dtype=jnp.float32)

    params = dict(
        wq=rn(ks[0], (E, E), 0.2), wk=rn(ks[1], (E, E), 0.2), wv=rn(ks[2], (E, E), 0.2),
        er=rn(ks[3], (L, dh), 0.2),
        ln_out_g=1.0 + 0.1 * rn(ks[4], (E,)), ln_out_b=0.1 * rn(ks[5], (E,)),
        ln1_g=1.0 + 0.1 * rn(ks[6], (E,)), ln1_b=0.1 * rn(ks[7], (E,)),
        w1=rn(ks[8], (Hd, E), 0.2), b1=0.1 * rn(ks[9], (Hd,)),
        w2=rn(ks[10], (E, Hd), 0.2), b2=0.1 * rn(ks[11], (E,)),
        ln2_g=1.0 + 0.1 * rn(ks[12], (E,)), ln2_b=0.1 * rn(ks[13], (E,)),
    )
    x = rn(ks[14], (B, L, E))

    # Default (production) path: bf16 MXU operands.
    out = transformer_encoder_forward(x, params, num_heads=H)
    out = jax.block_until_ready(out)
    # f32-MXU path: used for a tight validation of the kernel math / semantics.
    out_f32 = transformer_encoder_forward(x, params, num_heads=H, mxu_dtype=jnp.float32)
    out_f32 = jax.block_until_ready(out_f32)

    ref = reference_forward(x, params, num_heads=H)
    assert out.shape == (B, L, E)

    # Tight check on the f32-MXU run: catches any math/scale/skew/LN/GELU bug.
    err_f32 = float(jnp.max(jnp.abs(out_f32 - ref)))
    assert jnp.allclose(out_f32, ref, atol=1e-2, rtol=1e-2), f"f32 mismatch: {err_f32}"
    # bf16-MXU run checked within the bf16 rounding envelope (the two LayerNorms
    # amplify absolute rounding error ~4x); exactness is covered by the check above.
    err_bf16 = float(jnp.max(jnp.abs(out - ref)))
    assert jnp.allclose(out, ref, atol=6e-2, rtol=6e-2), f"bf16 mismatch: {err_bf16}"

    print("KERNEL_OK")
</pallas_src>

<mosaic_0001>
module attributes {stable_mosaic.version = 11 : i64} {
  func.func @_encoder_kernel(%arg0: i32, %arg1: memref<1x44x32xf32, #tpu.memory_space<vmem>>, %arg2: memref<1x4x44x44xf32, #tpu.memory_space<vmem>>, %arg3: memref<32x96xbf16, #tpu.memory_space<vmem>>, %arg4: memref<1x32xf32, #tpu.memory_space<vmem>>, %arg5: memref<1x32xf32, #tpu.memory_space<vmem>>, %arg6: memref<1x32xf32, #tpu.memory_space<vmem>>, %arg7: memref<1x32xf32, #tpu.memory_space<vmem>>, %arg8: memref<32x128xbf16, #tpu.memory_space<vmem>>, %arg9: memref<1x128xf32, #tpu.memory_space<vmem>>, %arg10: memref<128x32xbf16, #tpu.memory_space<vmem>>, %arg11: memref<1x32xf32, #tpu.memory_space<vmem>>, %arg12: memref<1x32xf32, #tpu.memory_space<vmem>>, %arg13: memref<1x32xf32, #tpu.memory_space<vmem>>, %arg14: memref<1x44x32xf32, #tpu.memory_space<vmem>>, %arg15: memref<44x32xf32, #tpu.memory_space<vmem>>) attributes {dimension_semantics = [#tpu.dimension_semantics<parallel>], iteration_bounds = array<i64: 2>, scalar_prefetch = 0 : i64, scratch_operands = 1 : i64, tpu.core_type = #tpu.core_type<tc>, window_params = [{transform_indices = @transform_0, window_bounds = array<i64: 1, 44, 32>}, {transform_indices = @transform_1, window_bounds = array<i64: 1, 4, 44, 44>}, {pipeline_mode = #tpu.pipeline_mode<synchronous>, transform_indices = @transform_2, window_bounds = array<i64: 32, 96>}, {pipeline_mode = #tpu.pipeline_mode<synchronous>, transform_indices = @transform_3, window_bounds = array<i64: 1, 32>}, {pipeline_mode = #tpu.pipeline_mode<synchronous>, transform_indices = @transform_4, window_bounds = array<i64: 1, 32>}, {pipeline_mode = #tpu.pipeline_mode<synchronous>, transform_indices = @transform_5, window_bounds = array<i64: 1, 32>}, {pipeline_mode = #tpu.pipeline_mode<synchronous>, transform_indices = @transform_6, window_bounds = array<i64: 1, 32>}, {pipeline_mode = #tpu.pipeline_mode<synchronous>, transform_indices = @transform_7, window_bounds = array<i64: 32, 128>}, {pipeline_mode = #tpu.pipeline_mode<synchronous>, transform_indices = @transform_8, window_bounds = array<i64: 1, 128>}, {pipeline_mode = #tpu.pipeline_mode<synchronous>, transform_indices = @transform_9, window_bounds = array<i64: 128, 32>}, {pipeline_mode = #tpu.pipeline_mode<synchronous>, transform_indices = @transform_10, window_bounds = array<i64: 1, 32>}, {pipeline_mode = #tpu.pipeline_mode<synchronous>, transform_indices = @transform_11, window_bounds = array<i64: 1, 32>}, {pipeline_mode = #tpu.pipeline_mode<synchronous>, transform_indices = @transform_12, window_bounds = array<i64: 1, 32>}, {transform_indices = @transform_13, window_bounds = array<i64: 1, 44, 32>}]} {
    %c0 = arith.constant 0 : index
    %c0_0 = arith.constant 0 : index
    %c0_1 = arith.constant 0 : index
    %0 = vector.load %arg1[%c0, %c0_0, %c0_1] : memref<1x44x32xf32, #tpu.memory_space<vmem>>, vector<1x44x32xf32>
    %1 = vector.shape_cast %0 : vector<1x44x32xf32> to vector<44x32xf32>
    %2 = arith.truncf %1 : vector<44x32xf32> to vector<44x32xbf16>
    %c0_2 = arith.constant 0 : index
    %c0_3 = arith.constant 0 : index
    %3 = vector.load %arg3[%c0_2, %c0_3] : memref<32x96xbf16, #tpu.memory_space<vmem>>, vector<32x96xbf16>
    %cst = arith.constant dense<0.000000e+00> : vector<44x96xf32>
    %4 = tpu.matmul %2, %3, %cst {dimension_numbers = #tpu.dot_dimension_numbers<[1], [0], [0], [1], [0, 0, 1, 1], [], []>} : vector<44x32xbf16>, vector<32x96xbf16>, vector<44x96xf32> -> vector<44x96xf32>
    %5 = vector.extract_strided_slice %4 {offsets = [0, 0], sizes = [44, 8], strides = [1, 1]} : vector<44x96xf32> to vector<44x8xf32>
    %6 = vector.extract_strided_slice %4 {offsets = [0, 32], sizes = [44, 8], strides = [1, 1]} : vector<44x96xf32> to vector<44x8xf32>
    %7 = vector.extract_strided_slice %4 {offsets = [0, 64], sizes = [44, 8], strides = [1, 1]} : vector<44x96xf32> to vector<44x8xf32>
    %cst_4 = arith.constant dense<0.000000e+00> : vector<44x44xf32>
    %8 = tpu.matmul %5, %6, %cst_4 {dimension_numbers = #tpu.dot_dimension_numbers<[1], [1], [0], [0], [0, 0, 1, 0], [], []>} : vector<44x8xf32>, vector<44x8xf32>, vector<44x44xf32> -> vector<44x44xf32>
    %c0_5 = arith.constant 0 : index
    %c0_6 = arith.constant 0 : index
    %c0_7 = arith.constant 0 : index
    %c0_8 = arith.constant 0 : index
    %9 = vector.load %arg2[%c0_5, %c0_6, %c0_7, %c0_8] : memref<1x4x44x44xf32, #tpu.memory_space<vmem>>, vector<1x1x44x44xf32>
    %10 = vector.shape_cast %9 : vector<1x1x44x44xf32> to vector<44x44xf32>
    %11 = arith.addf %8, %10 : vector<44x44xf32>
    %cst_9 = arith.constant 0.176776692 : f32
    %12 = vector.broadcast %cst_9 : f32 to vector<44x44xf32>
    %13 = arith.mulf %11, %12 : vector<44x44xf32>
    %cst_10 = arith.constant dense<0xFF800000> : vector<44xf32>
    %14 = vector.multi_reduction <maximumf>, %13, %cst_10 [1] : vector<44x44xf32> to vector<44xf32>
    %15 = vector.shape_cast %14 : vector<44xf32> to vector<44x1xf32>
    %16 = vector.broadcast %15 : vector<44x1xf32> to vector<44x44xf32>
    %17 = arith.subf %13, %16 : vector<44x44xf32>
    %18 = math.exp %17 : vector<44x44xf32>
    %cst_11 = arith.constant dense<0.000000e+00> : vector<44xf32>
    %19 = vector.multi_reduction <add>, %18, %cst_11 [1] : vector<44x44xf32> to vector<44xf32>
    %20 = vector.shape_cast %19 : vector<44xf32> to vector<44x1xf32>
    %21 = tpu.reciprocal %20 {approx = true} : vector<44x1xf32> -> vector<44x1xf32>
    %22 = vector.broadcast %21 : vector<44x1xf32> to vector<44x44xf32>
    %23 = arith.mulf %18, %22 : vector<44x44xf32>
    %cst_12 = arith.constant dense<0.000000e+00> : vector<44x8xf32>
    %24 = tpu.matmul %23, %7, %cst_12 {dimension_numbers = #tpu.dot_dimension_numbers<[1], [0], [0], [1], [0, 0, 1, 1], [], []>} : vector<44x44xf32>, vector<44x8xf32>, vector<44x8xf32> -> vector<44x8xf32>
    %c0_13 = arith.constant 0 : index
    %c0_14 = arith.constant 0 : index
    %25 = vector.load %arg15[%c0_13, %c0_14] : memref<44x32xf32, #tpu.memory_space<vmem>>, vector<44x8xf32>
    tpu.vector_store %arg15[%c0_13, %c0_14], %24 {strides = array<i32>} : memref<44x32xf32, #tpu.memory_space<vmem>>, vector<44x8xf32>,
    %26 = vector.extract_strided_slice %4 {offsets = [0, 8], sizes = [44, 8], strides = [1, 1]} : vector<44x96xf32> to vector<44x8xf32>
    %27 = vector.extract_strided_slice %4 {offsets = [0, 40], sizes = [44, 8], strides = [1, 1]} : vector<44x96xf32> to vector<44x8xf32>
    %28 = vector.extract_strided_slice %4 {offsets = [0, 72], sizes = [44, 8], strides = [1, 1]} : vector<44x96xf32> to vector<44x8xf32>
    %cst_15 = arith.constant dense<0.000000e+00> : vector<44x44xf32>
    %29 = tpu.matmul %26, %27, %cst_15 {dimension_numbers = #tpu.dot_dimension_numbers<[1], [1], [0], [0], [0, 0, 1, 0], [], []>} : vector<44x8xf32>, vector<44x8xf32>, vector<44x44xf32> -> vector<44x44xf32>
    %c0_16 = arith.constant 0 : index
    %c1 = arith.constant 1 : index
    %c0_17 = arith.constant 0 : index
    %c0_18 = arith.constant 0 : index
    %30 = vector.load %arg2[%c0_16, %c1, %c0_17, %c0_18] : memref<1x4x44x44xf32, #tpu.memory_space<vmem>>, vector<1x1x44x44xf32>
    %31 = vector.shape_cast %30 : vector<1x1x44x44xf32> to vector<44x44xf32>
    %32 = arith.addf %29, %31 : vector<44x44xf32>
    %cst_19 = arith.constant 0.176776692 : f32
    %33 = vector.broadcast %cst_19 : f32 to vector<44x44xf32>
    %34 = arith.mulf %32, %33 : vector<44x44xf32>
    %cst_20 = arith.constant dense<0xFF800000> : vector<44xf32>
    %35 = vector.multi_reduction <maximumf>, %34, %cst_20 [1] : vector<44x44xf32> to vector<44xf32>
    %36 = vector.shape_cast %35 : vector<44xf32> to vector<44x1xf32>
    %37 = vector.broadcast %36 : vector<44x1xf32> to vector<44x44xf32>
    %38 = arith.subf %34, %37 : vector<44x44xf32>
    %39 = math.exp %38 : vector<44x44xf32>
    %cst_21 = arith.constant dense<0.000000e+00> : vector<44xf32>
    %40 = vector.multi_reduction <add>, %39, %cst_21 [1] : vector<44x44xf32> to vector<44xf32>
    %41 = vector.shape_cast %40 : vector<44xf32> to vector<44x1xf32>
    %42 = tpu.reciprocal %41 {approx = true} : vector<44x1xf32> -> vector<44x1xf32>
    %43 = vector.broadcast %42 : vector<44x1xf32> to vector<44x44xf32>
    %44 = arith.mulf %39, %43 : vector<44x44xf32>
    %cst_22 = arith.constant dense<0.000000e+00> : vector<44x8xf32>
    %45 = tpu.matmul %44, %28, %cst_22 {dimension_numbers = #tpu.dot_dimension_numbers<[1], [0], [0], [1], [0, 0, 1, 1], [], []>} : vector<44x44xf32>, vector<44x8xf32>, vector<44x8xf32> -> vector<44x8xf32>
    %c0_23 = arith.constant 0 : index
    %c8 = arith.constant 8 : index
    %46 = vector.load %arg15[%c0_23, %c8] : memref<44x32xf32, #tpu.memory_space<vmem>>, vector<44x8xf32>
    tpu.vector_store %arg15[%c0_23, %c8], %45 {strides = array<i32>} : memref<44x32xf32, #tpu.memory_space<vmem>>, vector<44x8xf32>,
    %47 = vector.extract_strided_slice %4 {offsets = [0, 16], sizes = [44, 8], strides = [1, 1]} : vector<44x96xf32> to vector<44x8xf32>
    %48 = vector.extract_strided_slice %4 {offsets = [0, 48], sizes = [44, 8], strides = [1, 1]} : vector<44x96xf32> to vector<44x8xf32>
    %49 = vector.extract_strided_slice %4 {offsets = [0, 80], sizes = [44, 8], strides = [1, 1]} : vector<44x96xf32> to vector<44x8xf32>
    %cst_24 = arith.constant dense<0.000000e+00> : vector<44x44xf32>
    %50 = tpu.matmul %47, %48, %cst_24 {dimension_numbers = #tpu.dot_dimension_numbers<[1], [1], [0], [0], [0, 0, 1, 0], [], []>} : vector<44x8xf32>, vector<44x8xf32>, vector<44x44xf32> -> vector<44x44xf32>
    %c0_25 = arith.constant 0 : index
    %c2 = arith.constant 2 : index
    %c0_26 = arith.constant 0 : index
    %c0_27 = arith.constant 0 : index
    %51 = vector.load %arg2[%c0_25, %c2, %c0_26, %c0_27] : memref<1x4x44x44xf32, #tpu.memory_space<vmem>>, vector<1x1x44x44xf32>
    %52 = vector.shape_cast %51 : vector<1x1x44x44xf32> to vector<44x44xf32>
    %53 = arith.addf %50, %52 : vector<44x44xf32>
    %cst_28 = arith.constant 0.176776692 : f32
    %54 = vector.broadcast %cst_28 : f32 to vector<44x44xf32>
    %55 = arith.mulf %53, %54 : vector<44x44xf32>
    %cst_29 = arith.constant dense<0xFF800000> : vector<44xf32>
    %56 = vector.multi_reduction <maximumf>, %55, %cst_29 [1] : vector<44x44xf32> to vector<44xf32>
    %57 = vector.shape_cast %56 : vector<44xf32> to vector<44x1xf32>
    %58 = vector.broadcast %57 : vector<44x1xf32> to vector<44x44xf32>
    %59 = arith.subf %55, %58 : vector<44x44xf32>
    %60 = math.exp %59 : vector<44x44xf32>
    %cst_30 = arith.constant dense<0.000000e+00> : vector<44xf32>
    %61 = vector.multi_reduction <add>, %60, %cst_30 [1] : vector<44x44xf32> to vector<44xf32>
    %62 = vector.shape_cast %61 : vector<44xf32> to vector<44x1xf32>
    %63 = tpu.reciprocal %62 {approx = true} : vector<44x1xf32> -> vector<44x1xf32>
    %64 = vector.broadcast %63 : vector<44x1xf32> to vector<44x44xf32>
    %65 = arith.mulf %60, %64 : vector<44x44xf32>
    %cst_31 = arith.constant dense<0.000000e+00> : vector<44x8xf32>
    %66 = tpu.matmul %65, %49, %cst_31 {dimension_numbers = #tpu.dot_dimension_numbers<[1], [0], [0], [1], [0, 0, 1, 1], [], []>} : vector<44x44xf32>, vector<44x8xf32>, vector<44x8xf32> -> vector<44x8xf32>
    %c0_32 = arith.constant 0 : index
    %c16 = arith.constant 16 : index
    %67 = vector.load %arg15[%c0_32, %c16] : memref<44x32xf32, #tpu.memory_space<vmem>>, vector<44x8xf32>
    tpu.vector_store %arg15[%c0_32, %c16], %66 {strides = array<i32>} : memref<44x32xf32, #tpu.memory_space<vmem>>, vector<44x8xf32>,
    %68 = vector.extract_strided_slice %4 {offsets = [0, 24], sizes = [44, 8], strides = [1, 1]} : vector<44x96xf32> to vector<44x8xf32>
    %69 = vector.extract_strided_slice %4 {offsets = [0, 56], sizes = [44, 8], strides = [1, 1]} : vector<44x96xf32> to vector<44x8xf32>
    %70 = vector.extract_strided_slice %4 {offsets = [0, 88], sizes = [44, 8], strides = [1, 1]} : vector<44x96xf32> to vector<44x8xf32>
    %cst_33 = arith.constant dense<0.000000e+00> : vector<44x44xf32>
    %71 = tpu.matmul %68, %69, %cst_33 {dimension_numbers = #tpu.dot_dimension_numbers<[1], [1], [0], [0], [0, 0, 1, 0], [], []>} : vector<44x8xf32>, vector<44x8xf32>, vector<44x44xf32> -> vector<44x44xf32>
    %c0_34 = arith.constant 0 : index
    %c3 = arith.constant 3 : index
    %c0_35 = arith.constant 0 : index
    %c0_36 = arith.constant 0 : index
    %72 = vector.load %arg2[%c0_34, %c3, %c0_35, %c0_36] : memref<1x4x44x44xf32, #tpu.memory_space<vmem>>, vector<1x1x44x44xf32>
    %73 = vector.shape_cast %72 : vector<1x1x44x44xf32> to vector<44x44xf32>
    %74 = arith.addf %71, %73 : vector<44x44xf32>
    %cst_37 = arith.constant 0.176776692 : f32
    %75 = vector.broadcast %cst_37 : f32 to vector<44x44xf32>
    %76 = arith.mulf %74, %75 : vector<44x44xf32>
    %cst_38 = arith.constant dense<0xFF800000> : vector<44xf32>
    %77 = vector.multi_reduction <maximumf>, %76, %cst_38 [1] : vector<44x44xf32> to vector<44xf32>
    %78 = vector.shape_cast %77 : vector<44xf32> to vector<44x1xf32>
    %79 = vector.broadcast %78 : vector<44x1xf32> to vector<44x44xf32>
    %80 = arith.subf %76, %79 : vector<44x44xf32>
    %81 = math.exp %80 : vector<44x44xf32>
    %cst_39 = arith.constant dense<0.000000e+00> : vector<44xf32>
    %82 = vector.multi_reduction <add>, %81, %cst_39 [1] : vector<44x44xf32> to vector<44xf32>
    %83 = vector.shape_cast %82 : vector<44xf32> to vector<44x1xf32>
    %84 = tpu.reciprocal %83 {approx = true} : vector<44x1xf32> -> vector<44x1xf32>
    %85 = vector.broadcast %84 : vector<44x1xf32> to vector<44x44xf32>
    %86 = arith.mulf %81, %85 : vector<44x44xf32>
    %cst_40 = arith.constant dense<0.000000e+00> : vector<44x8xf32>
    %87 = tpu.matmul %86, %70, %cst_40 {dimension_numbers = #tpu.dot_dimension_numbers<[1], [0], [0], [1], [0, 0, 1, 1], [], []>} : vector<44x44xf32>, vector<44x8xf32>, vector<44x8xf32> -> vector<44x8xf32>
    %c0_41 = arith.constant 0 : index
    %c24 = arith.constant 24 : index
    %88 = vector.load %arg15[%c0_41, %c24] : memref<44x32xf32, #tpu.memory_space<vmem>>, vector<44x8xf32>
    tpu.vector_store %arg15[%c0_41, %c24], %87 {strides = array<i32>} : memref<44x32xf32, #tpu.memory_space<vmem>>, vector<44x8xf32>,
    %c0_42 = arith.constant 0 : index
    %c0_43 = arith.constant 0 : index
    %89 = vector.load %arg15[%c0_42, %c0_43] : memref<44x32xf32, #tpu.memory_space<vmem>>, vector<44x32xf32>
    %c0_44 = arith.constant 0 : index
    %c0_45 = arith.constant 0 : index
    %90 = vector.load %arg4[%c0_44, %c0_45] : memref<1x32xf32, #tpu.memory_space<vmem>>, vector<1x32xf32>
    %c0_46 = arith.constant 0 : index
    %c0_47 = arith.constant 0 : index
    %91 = vector.load %arg5[%c0_46, %c0_47] : memref<1x32xf32, #tpu.memory_space<vmem>>, vector<1x32xf32>
    %cst_48 = arith.constant dense<0.000000e+00> : vector<44xf32>
    %92 = vector.multi_reduction <add>, %89, %cst_48 [1] : vector<44x32xf32> to vector<44xf32>
    %93 = vector.shape_cast %92 : vector<44xf32> to vector<44x1xf32>
    %cst_49 = arith.constant 3.200000e+01 : f32
    %94 = vector.broadcast %cst_49 : f32 to vector<44x1xf32>
    %95 = arith.divf %93, %94 : vector<44x1xf32>
    %96 = vector.broadcast %95 : vector<44x1xf32> to vector<44x32xf32>
    %97 = arith.subf %89, %96 : vector<44x32xf32>
    %98 = arith.mulf %97, %97 : vector<44x32xf32>
    %cst_50 = arith.constant dense<0.000000e+00> : vector<44xf32>
    %99 = vector.multi_reduction <add>, %98, %cst_50 [1] : vector<44x32xf32> to vector<44xf32>
    %100 = vector.shape_cast %99 : vector<44xf32> to vector<44x1xf32>
    %cst_51 = arith.constant 3.200000e+01 : f32
    %101 = vector.broadcast %cst_51 : f32 to vector<44x1xf32>
    %102 = arith.divf %100, %101 : vector<44x1xf32>
    %cst_52 = arith.constant 9.99999974E-6 : f32
    %103 = vector.broadcast %cst_52 : f32 to vector<44x1xf32>
    %104 = arith.addf %102, %103 : vector<44x1xf32>
    %105 = math.rsqrt %104 : vector<44x1xf32>
    %106 = vector.broadcast %105 : vector<44x1xf32> to vector<44x32xf32>
    %107 = arith.mulf %97, %106 : vector<44x32xf32>
    %108 = vector.broadcast %90 : vector<1x32xf32> to vector<44x32xf32>
    %109 = arith.mulf %107, %108 : vector<44x32xf32>
    %110 = vector.broadcast %91 : vector<1x32xf32> to vector<44x32xf32>
    %111 = arith.addf %109, %110 : vector<44x32xf32>
    %112 = arith.addf %1, %111 : vector<44x32xf32>
    %c0_53 = arith.constant 0 : index
    %c0_54 = arith.constant 0 : index
    %113 = vector.load %arg6[%c0_53, %c0_54] : memref<1x32xf32, #tpu.memory_space<vmem>>, vector<1x32xf32>
    %c0_55 = arith.constant 0 : index
    %c0_56 = arith.constant 0 : index
    %114 = vector.load %arg7[%c0_55, %c0_56] : memref<1x32xf32, #tpu.memory_space<vmem>>, vector<1x32xf32>
    %cst_57 = arith.constant dense<0.000000e+00> : vector<44xf32>
    %115 = vector.multi_reduction <add>, %112, %cst_57 [1] : vector<44x32xf32> to vector<44xf32>
    %116 = vector.shape_cast %115 : vector<44xf32> to vector<44x1xf32>
    %cst_58 = arith.constant 3.200000e+01 : f32
    %117 = vector.broadcast %cst_58 : f32 to vector<44x1xf32>
    %118 = arith.divf %116, %117 : vector<44x1xf32>
    %119 = vector.broadcast %118 : vector<44x1xf32> to vector<44x32xf32>
    %120 = arith.subf %112, %119 : vector<44x32xf32>
    %121 = arith.mulf %120, %120 : vector<44x32xf32>
    %cst_59 = arith.constant dense<0.000000e+00> : vector<44xf32>
    %122 = vector.multi_reduction <add>, %121, %cst_59 [1] : vector<44x32xf32> to vector<44xf32>
    %123 = vector.shape_cast %122 : vector<44xf32> to vector<44x1xf32>
    %cst_60 = arith.constant 3.200000e+01 : f32
    %124 = vector.broadcast %cst_60 : f32 to vector<44x1xf32>
    %125 = arith.divf %123, %124 : vector<44x1xf32>
    %cst_61 = arith.constant 9.99999974E-6 : f32
    %126 = vector.broadcast %cst_61 : f32 to vector<44x1xf32>
    %127 = arith.addf %125, %126 : vector<44x1xf32>
    %128 = math.rsqrt %127 : vector<44x1xf32>
    %129 = vector.broadcast %128 : vector<44x1xf32> to vector<44x32xf32>
    %130 = arith.mulf %120, %129 : vector<44x32xf32>
    %131 = vector.broadcast %113 : vector<1x32xf32> to vector<44x32xf32>
    %132 = arith.mulf %130, %131 : vector<44x32xf32>
    %133 = vector.broadcast %114 : vector<1x32xf32> to vector<44x32xf32>
    %134 = arith.addf %132, %133 : vector<44x32xf32>
    %135 = arith.truncf %134 : vector<44x32xf32> to vector<44x32xbf16>
    %c0_62 = arith.constant 0 : index
    %c0_63 = arith.constant 0 : index
    %136 = vector.load %arg8[%c0_62, %c0_63] : memref<32x128xbf16, #tpu.memory_space<vmem>>, vector<32x128xbf16>
    %cst_64 = arith.constant dense<0.000000e+00> : vector<44x128xf32>
    %137 = tpu.matmul %135, %136, %cst_64 {dimension_numbers = #tpu.dot_dimension_numbers<[1], [0], [0], [1], [0, 0, 1, 1], [], []>} : vector<44x32xbf16>, vector<32x128xbf16>, vector<44x128xf32> -> vector<44x128xf32>
    %c0_65 = arith.constant 0 : index
    %c0_66 = arith.constant 0 : index
    %138 = vector.load %arg9[%c0_65, %c0_66] : memref<1x128xf32, #tpu.memory_space<vmem>>, vector<1x128xf32>
    %139 = vector.broadcast %138 : vector<1x128xf32> to vector<44x128xf32>
    %140 = arith.addf %137, %139 : vector<44x128xf32>
    %cst_67 = arith.constant 5.000000e-01 : f32
    %141 = vector.broadcast %cst_67 : f32 to vector<44x128xf32>
    %142 = arith.mulf %141, %140 : vector<44x128xf32>
    %cst_68 = arith.constant 0.707106769 : f32
    %143 = vector.broadcast %cst_68 : f32 to vector<44x128xf32>
    %144 = arith.mulf %140, %143 : vector<44x128xf32>
    %145 = math.absf %144 : vector<44x128xf32>
    %cst_69 = arith.constant 0.327591091 : f32
    %146 = vector.broadcast %cst_69 : f32 to vector<44x128xf32>
    %147 = arith.mulf %146, %145 : vector<44x128xf32>
    %cst_70 = arith.constant 1.000000e+00 : f32
    %148 = vector.broadcast %cst_70 : f32 to vector<44x128xf32>
    %149 = arith.addf %148, %147 : vector<44x128xf32>
    %cst_71 = arith.constant 1.000000e+00 : f32
    %150 = vector.broadcast %cst_71 : f32 to vector<44x128xf32>
    %151 = arith.divf %150, %149 : vector<44x128xf32>
    %cst_72 = arith.constant 1.06140542 : f32
    %152 = vector.broadcast %cst_72 : f32 to vector<44x128xf32>
    %153 = arith.mulf %152, %151 : vector<44x128xf32>
    %cst_73 = arith.constant -1.45315206 : f32
    %154 = vector.broadcast %cst_73 : f32 to vector<44x128xf32>
    %155 = arith.addf %153, %154 : vector<44x128xf32>
    %156 = arith.mulf %155, %151 : vector<44x128xf32>
    %cst_74 = arith.constant 1.42141378 : f32
    %157 = vector.broadcast %cst_74 : f32 to vector<44x128xf32>
    %158 = arith.addf %156, %157 : vector<44x128xf32>
    %159 = arith.mulf %158, %151 : vector<44x128xf32>
    %cst_75 = arith.constant -0.284496725 : f32
    %160 = vector.broadcast %cst_75 : f32 to vector<44x128xf32>
    %161 = arith.addf %159, %160 : vector<44x128xf32>
    %162 = arith.mulf %161, %151 : vector<44x128xf32>
    %cst_76 = arith.constant 0.254829586 : f32
    %163 = vector.broadcast %cst_76 : f32 to vector<44x128xf32>
    %164 = arith.addf %162, %163 : vector<44x128xf32>
    %165 = arith.mulf %164, %151 : vector<44x128xf32>
    %cst_77 = arith.constant 0.000000e+00 : f32
    %166 = vector.broadcast %cst_77 : f32 to vector<44x128xf32>
    %167 = arith.subf %166, %145 : vector<44x128xf32>
    %168 = arith.mulf %167, %145 : vector<44x128xf32>
    %169 = math.exp %168 : vector<44x128xf32>
    %170 = arith.mulf %165, %169 : vector<44x128xf32>
    %cst_78 = arith.constant 1.000000e+00 : f32
    %171 = vector.broadcast %cst_78 : f32 to vector<44x128xf32>
    %172 = arith.subf %171, %170 : vector<44x128xf32>
    %cst_79 = arith.constant 0.000000e+00 : f32
    %173 = vector.broadcast %cst_79 : f32 to vector<44x128xf32>
    %174 = arith.cmpf oge, %144, %173 : vector<44x128xf32>
    %cst_80 = arith.constant 0.000000e+00 : f32
    %175 = vector.broadcast %cst_80 : f32 to vector<44x128xf32>
    %176 = arith.subf %175, %172 : vector<44x128xf32>
    %177 = arith.select %174, %172, %176 : vector<44x128xi1>, vector<44x128xf32>
    %cst_81 = arith.constant 1.000000e+00 : f32
    %178 = vector.broadcast %cst_81 : f32 to vector<44x128xf32>
    %179 = arith.addf %178, %177 : vector<44x128xf32>
    %180 = arith.mulf %142, %179 : vector<44x128xf32>
    %181 = arith.truncf %180 : vector<44x128xf32> to vector<44x128xbf16>
    %c0_82 = arith.constant 0 : index
    %c0_83 = arith.constant 0 : index
    %182 = vector.load %arg10[%c0_82, %c0_83] : memref<128x32xbf16, #tpu.memory_space<vmem>>, vector<128x32xbf16>
    %cst_84 = arith.constant dense<0.000000e+00> : vector<44x32xf32>
    %183 = tpu.matmul %181, %182, %cst_84 {dimension_numbers = #tpu.dot_dimension_numbers<[1], [0], [0], [1], [0, 0, 1, 1], [], []>} : vector<44x128xbf16>, vector<128x32xbf16>, vector<44x32xf32> -> vector<44x32xf32>
    %c0_85 = arith.constant 0 : index
    %c0_86 = arith.constant 0 : index
    %184 = vector.load %arg11[%c0_85, %c0_86] : memref<1x32xf32, #tpu.memory_space<vmem>>, vector<1x32xf32>
    %185 = vector.broadcast %184 : vector<1x32xf32> to vector<44x32xf32>
    %186 = arith.addf %183, %185 : vector<44x32xf32>
    %187 = arith.addf %134, %186 : vector<44x32xf32>
    %c0_87 = arith.constant 0 : index
    %c0_88 = arith.constant 0 : index
    %188 = vector.load %arg12[%c0_87, %c0_88] : memref<1x32xf32, #tpu.memory_space<vmem>>, vector<1x32xf32>
    %c0_89 = arith.constant 0 : index
    %c0_90 = arith.constant 0 : index
    %189 = vector.load %arg13[%c0_89, %c0_90] : memref<1x32xf32, #tpu.memory_space<vmem>>, vector<1x32xf32>
    %cst_91 = arith.constant dense<0.000000e+00> : vector<44xf32>
    %190 = vector.multi_reduction <add>, %187, %cst_91 [1] : vector<44x32xf32> to vector<44xf32>
    %191 = vector.shape_cast %190 : vector<44xf32> to vector<44x1xf32>
    %cst_92 = arith.constant 3.200000e+01 : f32
    %192 = vector.broadcast %cst_92 : f32 to vector<44x1xf32>
    %193 = arith.divf %191, %192 : vector<44x1xf32>
    %194 = vector.broadcast %193 : vector<44x1xf32> to vector<44x32xf32>
    %195 = arith.subf %187, %194 : vector<44x32xf32>
    %196 = arith.mulf %195, %195 : vector<44x32xf32>
    %cst_93 = arith.constant dense<0.000000e+00> : vector<44xf32>
    %197 = vector.multi_reduction <add>, %196, %cst_93 [1] : vector<44x32xf32> to vector<44xf32>
    %198 = vector.shape_cast %197 : vector<44xf32> to vector<44x1xf32>
    %cst_94 = arith.constant 3.200000e+01 : f32
    %199 = vector.broadcast %cst_94 : f32 to vector<44x1xf32>
    %200 = arith.divf %198, %199 : vector<44x1xf32>
    %cst_95 = arith.constant 9.99999974E-6 : f32
    %201 = vector.broadcast %cst_95 : f32 to vector<44x1xf32>
    %202 = arith.addf %200, %201 : vector<44x1xf32>
    %203 = math.rsqrt %202 : vector<44x1xf32>
    %204 = vector.broadcast %203 : vector<44x1xf32> to vector<44x32xf32>
    %205 = arith.mulf %195, %204 : vector<44x32xf32>
    %206 = vector.broadcast %188 : vector<1x32xf32> to vector<44x32xf32>
    %207 = arith.mulf %205, %206 : vector<44x32xf32>
    %208 = vector.broadcast %189 : vector<1x32xf32> to vector<44x32xf32>
    %209 = arith.addf %207, %208 : vector<44x32xf32>
    %c0_96 = arith.constant 0 : index
    %c0_97 = arith.constant 0 : index
    %c0_98 = arith.constant 0 : index
    %210 = vector.load %arg14[%c0_96, %c0_97, %c0_98] : memref<1x44x32xf32, #tpu.memory_space<vmem>>, vector<1x44x32xf32>
    %211 = vector.shape_cast %210 : vector<1x44x32xf32> to vector<44x32xf32>
    %212 = vector.shape_cast %209 : vector<44x32xf32> to vector<1x44x32xf32>
    tpu.vector_store %arg14[%c0_96, %c0_97, %c0_98], %212 {strides = array<i32>} : memref<1x44x32xf32, #tpu.memory_space<vmem>>, vector<1x44x32xf32>,
    return
  }
  func.func @transform_0(%arg0: i32) -> (i32, i32, i32) {
    %c0_i32 = arith.constant 0 : i32
    %c0_i32_0 = arith.constant 0 : i32
    %c0_i32_1 = arith.constant 0 : i32
    return %arg0, %c0_i32, %c0_i32_0 : i32, i32, i32
  }
  func.func @transform_1(%arg0: i32) -> (i32, i32, i32, i32) {
    %c0_i32 = arith.constant 0 : i32
    %c0_i32_0 = arith.constant 0 : i32
    %c0_i32_1 = arith.constant 0 : i32
    %c0_i32_2 = arith.constant 0 : i32
    return %arg0, %c0_i32, %c0_i32_0, %c0_i32_1 : i32, i32, i32, i32
  }
  func.func @transform_2(%arg0: i32) -> (i32, i32) {
    %c0_i32 = arith.constant 0 : i32
    %c0_i32_0 = arith.constant 0 : i32
    %c0_i32_1 = arith.constant 0 : i32
    return %c0_i32, %c0_i32_0 : i32, i32
  }
  func.func @transform_3(%arg0: i32) -> (i32, i32) {
    %c0_i32 = arith.constant 0 : i32
    %c0_i32_0 = arith.constant 0 : i32
    %c0_i32_1 = arith.constant 0 : i32
    return %c0_i32, %c0_i32_0 : i32, i32
  }
  func.func @transform_4(%arg0: i32) -> (i32, i32) {
    %c0_i32 = arith.constant 0 : i32
    %c0_i32_0 = arith.constant 0 : i32
    %c0_i32_1 = arith.constant 0 : i32
    return %c0_i32, %c0_i32_0 : i32, i32
  }
  func.func @transform_5(%arg0: i32) -> (i32, i32) {
    %c0_i32 = arith.constant 0 : i32
    %c0_i32_0 = arith.constant 0 : i32
    %c0_i32_1 = arith.constant 0 : i32
    return %c0_i32, %c0_i32_0 : i32, i32
  }
  func.func @transform_6(%arg0: i32) -> (i32, i32) {
    %c0_i32 = arith.constant 0 : i32
    %c0_i32_0 = arith.constant 0 : i32
    %c0_i32_1 = arith.constant 0 : i32
    return %c0_i32, %c0_i32_0 : i32, i32
  }
  func.func @transform_7(%arg0: i32) -> (i32, i32) {
    %c0_i32 = arith.constant 0 : i32
    %c0_i32_0 = arith.constant 0 : i32
    %c0_i32_1 = arith.constant 0 : i32
    return %c0_i32, %c0_i32_0 : i32, i32
  }
  func.func @transform_8(%arg0: i32) -> (i32, i32) {
    %c0_i32 = arith.constant 0 : i32
    %c0_i32_0 = arith.constant 0 : i32
    %c0_i32_1 = arith.constant 0 : i32
    return %c0_i32, %c0_i32_0 : i32, i32
  }
  func.func @transform_9(%arg0: i32) -> (i32, i32) {
    %c0_i32 = arith.constant 0 : i32
    %c0_i32_0 = arith.constant 0 : i32
    %c0_i32_1 = arith.constant 0 : i32
    return %c0_i32, %c0_i32_0 : i32, i32
  }
  func.func @transform_10(%arg0: i32) -> (i32, i32) {
    %c0_i32 = arith.constant 0 : i32
    %c0_i32_0 = arith.constant 0 : i32
    %c0_i32_1 = arith.constant 0 : i32
    return %c0_i32, %c0_i32_0 : i32, i32
  }
  func.func @transform_11(%arg0: i32) -> (i32, i32) {
    %c0_i32 = arith.constant 0 : i32
    %c0_i32_0 = arith.constant 0 : i32
    %c0_i32_1 = arith.constant 0 : i32
    return %c0_i32, %c0_i32_0 : i32, i32
  }
  func.func @transform_12(%arg0: i32) -> (i32, i32) {
    %c0_i32 = arith.constant 0 : i32
    %c0_i32_0 = arith.constant 0 : i32
    %c0_i32_1 = arith.constant 0 : i32
    return %c0_i32, %c0_i32_0 : i32, i32
  }
  func.func @transform_13(%arg0: i32) -> (i32, i32, i32) {
    %c0_i32 = arith.constant 0 : i32
    %c0_i32_0 = arith.constant 0 : i32
    %c0_i32_1 = arith.constant 0 : i32
    return %arg0, %c0_i32, %c0_i32_0 : i32, i32, i32
  }
}

</mosaic_0001>

<bundles_post_ra>
// kernel: transformer_encoder_forward.1
= control target key start
LH: loop header
LB: loop body
LE: loop exit
PB: predicated region body
PF: predicated region fallthrough
CT: control target
= control target key end

     0   :  { %s3629_s25 = smov 0   ;;  %s4404_s0 = inlined_call_operand.vmem [shape: f32[2,44,32], index: 0, kind: input, shape index: {}]   ;;  %s4405_s1 = inlined_call_operand.vmem [shape: f32[2,4,44,44], index: 1, kind: input, shape index: {}]   ;;  %s4406_s2 = inlined_call_operand.vmem [shape: bf16[32,96], index: 2, kind: input, shape index: {}]   ;;  %s4407_s3 = inlined_call_operand.vmem [shape: f32[1,32], index: 3, kind: input, shape index: {}]   ;;  %s4408_s4 = inlined_call_operand.vmem [shape: f32[1,32], index: 4, kind: input, shape index: {}]   ;;  %s4409_s5 = inlined_call_operand.vmem [shape: f32[1,32], index: 5, kind: input, shape index: {}]   ;;  %s4410_s6 = inlined_call_operand.vmem [shape: f32[1,32], index: 6, kind: input, shape index: {}]   ;;  %s4411_s7 = inlined_call_operand.vmem [shape: bf16[32,128], index: 7, kind: input, shape index: {}]   ;;  %s4412_s8 = inlined_call_operand.vmem [shape: f32[1,128], index: 8, kind: input, shape index: {}]   ;;  %s4413_s9 = inlined_call_operand.vmem [shape: bf16[128,32], index: 9, kind: input, shape index: {}]   ;;  %s4414_s10 = inlined_call_operand.vmem [shape: f32[1,32], index: 10, kind: input, shape index: {}]   ;;  %s4415_s11 = inlined_call_operand.vmem [shape: f32[1,32], index: 11, kind: input, shape index: {}]   ;;  %s4416_s12 = inlined_call_operand.vmem [shape: f32[1,32], index: 12, kind: input, shape index: {}]   ;;  %s4417_s13 = inlined_call_operand.vmem [shape: f32[2,44,32], index: 13, kind: output, shape index: {}]  }
   0x1 LB: > { %s2860_s26 = sadd.s32 4294967295, %s3541_s25   ;;  %p2864_p0 = scmp.ge.s32.totalorder %s3541_s25, 1  ;;  %s3541_s25 = sphi %s3629_s25, %s23_s25  }
   0x2   : > { %p397_p1 = scmp.lt.s32.totalorder %s3541_s25, 3 }
   0x4   : > { %p398_p2 = pnand %p2864_p0, %p397_p1 }
   0x5   : > { %p446_p3 = scmp.lt.s32.totalorder (!%p398_p2), %s2860_s26, 1  ;;  %s3545_s18 = smov (!%p398_p2), 96  }
   0x6   : > { %401 = sbr.rel (%p398_p2) target bundleno = 3813 (0xee5), region = 72  ;;  %s3546_s19 = smov (!%p398_p2), 88  }
   0x7   : > { %s3547_s20 = smov (!%p398_p2), 120   ;;  %s3548_s21 = smov (!%p398_p2), 64  }
   0x8   : > { %s3549_s22 = smov (!%p398_p2), 56   ;;  %s3550_s29 = smov (!%p398_p2), 80  }
   0x9   : > { %s3551_s30 = smov (!%p398_p2), 112   ;;  %s3552_s15 = smov (!%p398_p2), 48  }
   0xa   : > { %s3553_s16 = smov (!%p398_p2), 72  }
   0xb   : > { %v3361_v0 = vld [vmem:[%s4406_s2 + $0x8] sm:$0xff]   ;;  %v3543_v1 = vmov 0.0   ;;  %v3362_v2 = vld [vmem:[%s4406_s2] sm:$0xff]   ;;  %vm3544_vm0 = vmmov 0   ;;  %s4419_s26 = smov (!%p446_p3, %s2860_s26), 1  ;;  %vm487_vm1 = vcmask 261120  }
   0xc   : > { %3107 = vmatprep.subr.bf16.mxu1 %v3543_v1  ;;  %3111 = vmatprep.mubr.msk.bf16.mxu1 %vm3544_vm0, %v3543_v1  ;;  %s3335_s14 = smul.u32 48, %s4419_s26  ;;  %vm578_vm2 = vcmask 64512   ;;  %vm807_vm3 = vcmask 1043456   ;;  %vm704_vm4 = vcmask 359424   ;;  %vm720_vm5 = vcmask 355328  }
   0xd   : > { %3108 = vmatpush3.bf16.msra.mxu1 %v3361_v0  ;;  %s3336_s23 = smul.u32 192, %s4419_s26  ;;  %vm910_vm6 = vcmask 60416   ;;  %vm1290_vm7 = vcmask 130112   ;;  %vm1676_vm8 = vcmask 195712   ;;  %vm2062_vm9 = vcmask 261312  }
   0xe   : > { %3109 = vmatprep.subr.bf16.mxu1 %v3543_v1  ;;  %s3655_s17 = scalar_lea.vmem %s4404_s0, %s3335_s14  ;;  %vm1296_vm10 = vcmask 126016   ;;  %vm1682_vm11 = vcmask 191616   ;;  %vm2068_vm12 = vcmask 257216   ;;  %vm2093_vm13 = vcmask 257024  }
   0xf   : > { %v462_v3 = vld [vmem:[%s3655_s17] sm:$0xff]  ;;  %v463_v4 = vld [vmem:[%s3655_s17 + $0x8] sm:$0xff]  ;;  %v464_v6 = vld [vmem:[%s3655_s17 + $0x10] sm:$0xff]  ;;  %s3768_s28 = scalar_lea.vmem %s4405_s1, %s3336_s23 }
  0x10   : > { %v468_v5 = vpack.c.bf16 %v463_v4, %v462_v3  ;;  %v465_v7 = vld [vmem:[%s3655_s17 + $0x18] sm:$0xff]  ;;  %v466_v9 = vld [vmem:[%s3655_s17 + $0x20] sm:$0xff]  ;;  %v467_v10 = vld [vmem:[%s3655_s17 + $0x28] sm:$0xf] }
  0x11   : > { %3110 = vmatpush3.bf16.msra.mxu1 %v3362_v2  ;;  %v469_v8 = vpack.c.bf16 %v465_v7, %v464_v6  ;;  %v470_v11 = vpack.c.bf16 %v467_v10, %v466_v9  ;;  %v555_v51 = vld [vmem:[%s3768_s28 + $0x8] sm:$0xff]  ;;  %v554_v58 = vld [vmem:[%s3768_s28] sm:$0xff]  ;;  %v2893_v60 = vld [vmem:[%s3768_s28 + $0x38] sm:$0xff] }
  0x12   : > { %v2892_v63 = vld [vmem:[%s3768_s28 + $0x30] sm:$0xff]  ;;  %v557_v3 = vld [vmem:[%s3768_s28 + $0x18] sm:$0xff]  ;;  %v2894_v10 = vld [vmem:[%s3768_s28 + $0x40] sm:$0xff] }
  0x14   : > { %3112 = vmatmul.mubr.msk.bf16.vlgmr.msra.gmra.mxu1 %vm487_vm1, %v468_v5 }
  0x15   : > { %3115 = vmatprep.mubr.msk.bf16.mxu1 %vm3544_vm0, %v3543_v1 }
  0x1c   : > { %3116 = vmatmul.mubr.msk.bf16.gmra.mxu1 %vm487_vm1, %v469_v8  ;;  %v558_v8 = vld [vmem:[%s3768_s28 + $0x20] sm:$0xff] }
  0x1d   : > { %3119 = vmatprep.mubr.msk.bf16.mxu1 %vm3544_vm0, %v3543_v1 }
  0x24   : > { %3120 = vmatmul.mubr.msk.bf16.gmra.mxu1 %vm487_vm1, %v470_v11 }
  0xd4   : > { %v3670_v12 = vpop.f32.mrf.mxu1 }
  0xd5   : > { %3135 = vmatprep.mubr.msk.f32.mxu0 %vm578_vm2, %v3670_v12 }
  0xd6   : > { %v3113_v13 = vpop.f32.mrf.mxu1 }
  0xd8   : > { %v3674_v14 = vpop.f32.mrf.mxu1 }
  0xda   : > { %v3114_v15 = vpop.f32.mrf.mxu1 }
  0xdc   : > { %v3676_v16 = vpop.f32.mrf.mxu1 }
  0xde   : > { %v3117_v17 = vpop.f32.mrf.mxu1 }
  0xe0   : > { %v3678_v18 = vpop.f32.mrf.mxu1 }
  0xe1   : > { %572 = vrot.lane.b32.xlu1 %v3678_v18, %s3545_s18 }
  0xe2   : > { %v3118_v19 = vpop.f32.mrf.mxu1 }
  0xe3   : > { %v2895_v19 = vld [vmem:[%s3768_s28 + $0x48] sm:$0xff] }
  0xe4   : > { %v3681_v20 = vpop.f32.mrf.mxu1 }
  0xe5   : > { %570 = vrot.lane.b32.xlu1 %v3676_v16, %s3545_s18 }
  0xe6   : > { %v3121_v21 = vpop.f32.mrf.mxu1 }
  0xe8   : > { %v3684_v22 = vpop.f32.mrf.mxu1 }
  0xe9   : > { %568 = vrot.lane.b32.xlu1 %v3674_v14, %s3545_s18  ;;  %576 = vrot.lane.b32.xlu0 %v3684_v22, %s3545_s18 }
  0xea   : > { %v3122_v23 = vpop.f32.mrf.mxu1 }
  0xed   : > { %566 = vrot.lane.b32.xlu1 %v3670_v12, %s3545_s18  ;;  %574 = vrot.lane.b32.xlu0 %v3681_v20, %s3545_s18  ;;  %s3554_s18 = smov 104  }
  0xf1   : > { %935 = vrot.lane.b32.xlu1 %v3676_v16, %s3546_s19  ;;  %941 = vrot.lane.b32.xlu0 %v3684_v22, %s3546_s19 }
  0xf5   : > { %931 = vrot.lane.b32.xlu1 %v3670_v12, %s3546_s19  ;;  %939 = vrot.lane.b32.xlu0 %v3681_v20, %s3546_s19 }
  0xf9   : > { %921 = vrot.lane.b32.xlu1 %v3674_v14, %s3547_s20  ;;  %937 = vrot.lane.b32.xlu0 %v3678_v18, %s3546_s19 }
  0xfd   : > { %925 = vrot.lane.b32.xlu1 %v3678_v18, %s3547_s20  ;;  %933 = vrot.lane.b32.xlu0 %v3674_v14, %s3546_s19  ;;  %s3555_s19 = smov 40  }
 0x101   : > { %929 = vrot.lane.b32.xlu1 %v3684_v22, %s3547_s20  ;;  %919 = vrot.lane.b32.xlu0 %v3670_v12, %s3547_s20 }
 0x105   : > { %778 = vrot.lane.b32.xlu1 %v3678_v18, %s3548_s21  ;;  %923 = vrot.lane.b32.xlu0 %v3676_v16, %s3547_s20 }
 0x109   : > { %776 = vrot.lane.b32.xlu1 %v3676_v16, %s3548_s21  ;;  %927 = vrot.lane.b32.xlu0 %v3681_v20, %s3547_s20  ;;  %s3556_s20 = smov 8  }
 0x10d   : > { %772 = vrot.lane.b32.xlu1 %v3670_v12, %s3548_s21  ;;  %780 = vrot.lane.b32.xlu0 %v3681_v20, %s3548_s21 }
 0x111   : > { %1142 = vrot.lane.b32.xlu1 %v3681_v20, %s3549_s22  ;;  %774 = vrot.lane.b32.xlu0 %v3674_v14, %s3548_s21 }
 0x115   : > { %782 = vrot.lane.b32.xlu1 %v3684_v22, %s3548_s21  ;;  %1140 = vrot.lane.b32.xlu0 %v3678_v18, %s3549_s22  ;;  %s3557_s21 = smov 16  }
 0x119   : > { %1144 = vrot.lane.b32.xlu0 %v3684_v22, %s3549_s22 }
 0x153   : > { %v573_v24 = vpop.permute.xlu1 %572 }
 0x157   : > { %v571_v25 = vpop.permute.xlu1 %570 }
 0x15b   : > { %v569_v26 = vpop.permute.xlu1 %568  ;;  %v577_v27 = vpop.permute.xlu0 %576 }
 0x15c   : > { %3123 = vmatprep.subr.msk.mxu0 %vm578_vm2, %v577_v27 }
 0x15d   : > { %3124 = vmatpush3.xpose.msk.msra.mxu0 %vm578_vm2, %v577_v27 }
 0x15f   : > { %v567_v28 = vpop.permute.xlu1 %566  ;;  %v575_v29 = vpop.permute.xlu0 %574 }
 0x160   : > { %3125 = vmatprep.subr.msk.mxu0 %vm578_vm2, %v575_v29 }
 0x161   : > { %3126 = vmatpush3.xpose.msk.msra.mxu0 %vm578_vm2, %v575_v29 }
 0x162   : > { %3127 = vmatprep.subr.msk.mxu0 %vm578_vm2, %v573_v24 }
 0x163   : > { %v936_v30 = vpop.permute.xlu1 %935  ;;  %v942_v31 = vpop.permute.xlu0 %941 }
 0x164   : > { %3165 = vmatprep.subr.msk.mxu1 %vm578_vm2, %v942_v31 }
 0x165   : > { %3128 = vmatpush3.xpose.msk.msra.mxu0 %vm578_vm2, %v573_v24  ;;  %3166 = vmatpush3.xpose.msk.msra.mxu1 %vm578_vm2, %v942_v31 }
 0x166   : > { %3129 = vmatprep.subr.msk.mxu0 %vm578_vm2, %v571_v25 }
 0x167   : > { %v932_v32 = vpop.permute.xlu1 %931  ;;  %v940_v33 = vpop.permute.xlu0 %939 }
 0x168   : > { %3167 = vmatprep.subr.msk.mxu1 %vm578_vm2, %v940_v33 }
 0x169   : > { %3130 = vmatpush3.xpose.msk.msra.mxu0 %vm578_vm2, %v571_v25  ;;  %3168 = vmatpush3.xpose.msk.msra.mxu1 %vm578_vm2, %v940_v33 }
 0x16a   : > { %3131 = vmatprep.subr.msk.mxu0 %vm578_vm2, %v569_v26 }
 0x16b   : > { %v922_v34 = vpop.permute.xlu1 %921  ;;  %v938_v35 = vpop.permute.xlu0 %937 }
 0x16c   : > { %3169 = vmatprep.subr.msk.mxu1 %vm578_vm2, %v938_v35 }
 0x16d   : > { %3132 = vmatpush3.xpose.msk.msra.mxu0 %vm578_vm2, %v569_v26  ;;  %3170 = vmatpush3.xpose.msk.msra.mxu1 %vm578_vm2, %v938_v35 }
 0x16e   : > { %3133 = vmatprep.subr.msk.mxu0 %vm578_vm2, %v567_v28  ;;  %3171 = vmatprep.subr.msk.mxu1 %vm578_vm2, %v936_v30 }
 0x16f   : > { %v926_v36 = vpop.permute.xlu1 %925  ;;  %v934_v37 = vpop.permute.xlu0 %933 }
 0x171   : > { %3134 = vmatpush3.xpose.msk.msra.mxu0 %vm578_vm2, %v567_v28  ;;  %3172 = vmatpush3.xpose.msk.msra.mxu1 %vm578_vm2, %v936_v30  ;;  %v556_v30 = vld [vmem:[%s3768_s28 + $0x10] sm:$0xff] }
 0x172   : > { %3173 = vmatprep.subr.msk.mxu1 %vm578_vm2, %v934_v37 }
 0x173   : > { %v930_v38 = vpop.permute.xlu1 %929  ;;  %v920_v39 = vpop.permute.xlu0 %919 }
 0x174   : > { %3136 = vmatmul.mubr.msk.f32.vlgmr.msra.gmra.mxu0 %vm578_vm2, %v3674_v14  ;;  %3177 = vmatprep.mubr.msk.f32.mxu1 %vm578_vm2, %v920_v39 }
 0x175   : > { %3138 = vmatprep.mubr.msk.f32.mxu0 %vm578_vm2, %v3676_v16  ;;  %3174 = vmatpush3.xpose.msk.msra.mxu1 %vm578_vm2, %v934_v37 }
 0x176   : > { %3175 = vmatprep.subr.msk.mxu1 %vm578_vm2, %v932_v32 }
 0x177   : > { %v779_v40 = vpop.permute.xlu1 %778  ;;  %v924_v41 = vpop.permute.xlu0 %923 }
 0x178   : > { %3139 = vmatmul.mubr.msk.f32.gmra.mxu0 %vm578_vm2, %v3678_v18 }
 0x179   : > { %3141 = vmatprep.mubr.msk.f32.mxu0 %vm578_vm2, %v3681_v20  ;;  %3176 = vmatpush3.xpose.msk.msra.mxu1 %vm578_vm2, %v932_v32 }
 0x17b   : > { %v777_v42 = vpop.permute.xlu1 %776  ;;  %v928_v43 = vpop.permute.xlu0 %927 }
 0x17c   : > { %3142 = vmatmul.mubr.msk.f32.gmra.mxu0 %vm578_vm2, %v3684_v22  ;;  %3178 = vmatmul.mubr.msk.f32.vlgmr.msra.gmra.mxu1 %vm578_vm2, %v922_v34 }
 0x17d   : > { %3180 = vmatprep.mubr.msk.f32.mxu1 %vm578_vm2, %v924_v41  ;;  %v2897_v41 = vld [vmem:[%s3768_s28 + $0x58] sm:$0xf] }
 0x17f   : > { %v773_v44 = vpop.permute.xlu1 %772  ;;  %v781_v45 = vpop.permute.xlu0 %780 }
 0x180   : > { %3181 = vmatmul.mubr.msk.f32.gmra.mxu1 %vm578_vm2, %v926_v36  ;;  %v559_v36 = vld [vmem:[%s3768_s28 + $0x28] sm:$0xf] }
 0x181   : > { %3183 = vmatprep.mubr.msk.f32.mxu1 %vm578_vm2, %v928_v43 }
 0x183   : > { %v3753_v46 = vpop.permute.xlu1 %1142  ;;  %v775_v47 = vpop.permute.xlu0 %774 }
 0x184   : > { %3184 = vmatmul.mubr.msk.f32.gmra.mxu1 %vm578_vm2, %v930_v38 }
 0x187   : > { %v783_v48 = vpop.permute.xlu1 %782  ;;  %v3758_v49 = vpop.permute.xlu0 %1140 }
 0x188   : > { %3144 = vmatprep.subr.msk.mxu0 %vm807_vm3, %v783_v48 }
 0x189   : > { %3145 = vmatpush3.msk.msra.mxu0 %vm807_vm3, %v783_v48 }
 0x18a   : > { %3146 = vmatprep.subr.mxu0 %v781_v45 }
 0x18b   : > { %3147 = vmatpush3.msra.mxu0 %v781_v45  ;;  %v3760_v50 = vpop.permute.xlu0 %1144 }
 0x18c   : > { %3148 = vmatprep.subr.mxu0 %v779_v40 }
 0x18d   : > { %3149 = vmatpush3.msra.mxu0 %v779_v40 }
 0x18e   : > { %3150 = vmatprep.subr.mxu0 %v777_v42 }
 0x18f   : > { %3151 = vmatpush3.msra.mxu0 %v777_v42 }
 0x190   : > { %3152 = vmatprep.subr.mxu0 %v775_v47 }
 0x191   : > { %3153 = vmatpush3.msra.mxu0 %v775_v47 }
 0x192   : > { %3154 = vmatprep.subr.mxu0 %v773_v44 }
 0x193   : > { %3155 = vmatpush3.msra.mxu0 %v773_v44 }
 0x194   : > { %3186 = vmatprep.subr.msk.mxu0 %vm807_vm3, %v3760_v50 }
 0x234   : > { %v3137_v52 = vpop.f32.mrf.mxu0 }
 0x235   : > { %v675_v53 = vadd.f32 %v3137_v52, %v555_v51 }
 0x236   : > { %v669_v54 = vpop.f32.mrf.mxu0 }
 0x237   : > { %v3771_v55 = vmul.f32 0.17677669, %v675_v53  ;;  %v670_v0 = vadd.f32 %v669_v54, %v554_v58  ;;  %v2896_v53 = vld [vmem:[%s3768_s28 + $0x50] sm:$0xff] }
 0x238   : > { %v3140_v56 = vpop.f32.mrf.mxu0 }
 0x239   : > { %v708_v57 = vsel %vm704_vm4, %v3771_v55, -inf  ;;  %v3783_v11 = vmul.f32 0.17677669, %v670_v0  ;;  %v685_v13 = vadd.f32 %v3140_v56, %v557_v3 }
 0x23a   : > { %709 = vmax.xlane.f32.xlu1 %v708_v57  ;;  %v679_v59 = vpop.f32.mrf.mxu0 }
 0x23b   : > { %v3792_v26 = vmul.f32 0.17677669, %v685_v13  ;;  %v705_v29 = vsel %vm704_vm4, %v3783_v11, -inf  ;;  %v680_v33 = vadd.f32 %v679_v59, %v556_v30 }
 0x23c   : > { %v3143_v61 = vpop.f32.mrf.mxu0  ;;  %v3179_v62 = vpop.f32.mrf.mxu1 }
 0x23d   : > { %v1039_v2 = vadd.f32 %v3179_v62, %v2893_v60  ;;  %v714_v35 = vsel %vm704_vm4, %v3792_v26, -inf  ;;  %v700_v38 = vmul.f32 0.17677669, %v680_v33  ;;  %v695_v39 = vadd.f32 %v3143_v61, %v559_v36 }
 0x23e   : > { %v1033_v4 = vpop.f32.mrf.mxu1  ;;  %v689_v7 = vpop.f32.mrf.mxu0 }
 0x23f   : > { %v3779_v5 = vmul.f32 0.17677669, %v1039_v2  ;;  %v1034_v6 = vadd.f32 %v2892_v63, %v1033_v4  ;;  %v690_v23 = vadd.f32 %v689_v7, %v558_v8  ;;  %v3807_v43 = vmul.f32 0.17677669, %v695_v39 }
 0x240   : > { %v3182_v9 = vpop.f32.mrf.mxu1  ;;  %v711_v45 = vsel %vm704_vm4, %v700_v38, -inf }
 0x241   : > { %v3785_v15 = vmul.f32 0.17677669, %v1034_v6  ;;  %v1071_v17 = vsel %vm704_vm4, %v3779_v5, -inf  ;;  %v1049_v27 = vadd.f32 %v3182_v9, %v2895_v19  ;;  %v3797_v31 = vmul.f32 0.17677669, %v690_v23 }
 0x242   : > { %1072 = vmax.xlane.f32.xlu0 %v1071_v17  ;;  %v1043_v21 = vpop.f32.mrf.mxu1  ;;  %v721_v48 = vsel %vm720_vm5, %v3807_v43, -inf }
 0x243   : > { %v1044_v24 = vadd.f32 %v2894_v10, %v1043_v21  ;;  %v1068_v25 = vsel %vm704_vm4, %v3785_v15, -inf  ;;  %v1065_v34 = vmul.f32 0.17677669, %v1049_v27  ;;  %v717_v37 = vsel %vm704_vm4, %v3797_v31, -inf }
 0x244   : > { %1069 = vmax.xlane.f32.xlu1 %v1068_v25  ;;  %v3185_v42 = vpop.f32.mrf.mxu1 }
 0x245   : > { %v1064_v28 = vmul.f32 0.17677669, %v1044_v24  ;;  %v1077_v40 = vsel %vm704_vm4, %v1065_v34, -inf  ;;  %v1059_v44 = vadd.f32 %v3185_v42, %v2897_v41 }
 0x246   : > { %706 = vmax.xlane.f32.xlu0 %v705_v29  ;;  %v1053_v52 = vpop.f32.mrf.mxu1 }
 0x247   : > { %v1074_v32 = vsel %vm704_vm4, %v1064_v28, -inf  ;;  %v3810_v47 = vmul.f32 0.17677669, %v1059_v44  ;;  %v1054_v54 = vadd.f32 %v2896_v53, %v1053_v52 }
 0x248   : > { %1075 = vmax.xlane.f32.xlu1 %v1074_v32 }
 0x249   : > { %v1083_v51 = vsel %vm720_vm5, %v3810_v47, -inf  ;;  %v3823_v56 = vmul.f32 0.17677669, %v1054_v54 }
 0x24a   : > { %715 = vmax.xlane.f32.xlu0 %v714_v35 }
 0x24b   : > { %v1080_v57 = vsel %vm704_vm4, %v3823_v56, -inf }
 0x24c   : > { %718 = vmax.xlane.f32.xlu1 %v717_v37 }
 0x24e   : > { %1078 = vmax.xlane.f32.xlu0 %v1077_v40 }
 0x252   : > { %712 = vmax.xlane.f32.xlu0 %v711_v45 }
 0x256   : > { %722 = vmax.xlane.f32.xlu0 %v721_v48 }
 0x25a   : > { %1084 = vmax.xlane.f32.xlu0 %v1083_v51 }
 0x25d   : > { %1138 = vrot.lane.b32.xlu1 %v3676_v16, %s3549_s22 }
 0x270   : > { %1136 = vrot.lane.b32.xlu0 %v3674_v14, %s3549_s22 }
 0x274   : > { %1327 = vrot.lane.b32.xlu0 %v3684_v22, %s3550_s29 }
 0x281   : > { %1081 = vmax.xlane.f32.xlu1 %v1080_v57 }
 0x292   : > { %1134 = vrot.lane.b32.xlu1 %v3670_v12, %s3549_s22  ;;  %s3558_s22 = smov 24  }
 0x2c3   : > { %v710_v58 = vpop.xlane.xlu1 %709 }
 0x2c4   : > { %v725_v59 = vsub.f32 %v3771_v55, %v710_v58 }
 0x2c6   : > { %v732_v60 = vmul.f32 1.442695, %v725_v59 }
 0x2c8   : > { %3373 = vpow2.f32 %v732_v60 }
 0x2cb   : > { %v1073_v61 = vpop.xlane.xlu0 %1072 }
 0x2cc   : > { %v1087_v62 = vsub.f32 %v3779_v5, %v1073_v61 }
 0x2cd   : > { %v1070_v63 = vpop.xlane.xlu1 %1069 }
 0x2ce   : > { %v1094_v0 = vmul.f32 1.442695, %v1087_v62  ;;  %v1086_v2 = vsub.f32 %v3785_v15, %v1070_v63 }
 0x2cf   : > { %v707_v3 = vpop.xlane.xlu0 %706 }
 0x2d0   : > { %3375 = vpow2.f32 %v1094_v0  ;;  %v724_v4 = vsub.f32 %v3783_v11, %v707_v3  ;;  %v1092_v7 = vmul.f32 1.442695, %v1086_v2 }
 0x2d1   : > { %v1076_v6 = vpop.xlane.xlu1 %1075 }
 0x2d2   : > { %v730_v8 = vmul.f32 1.442695, %v724_v4  ;;  %v1088_v9 = vsub.f32 %v1064_v28, %v1076_v6 }
 0x2d3   : > { %v716_v10 = vpop.xlane.xlu0 %715 }
 0x2d4   : > { %3377 = vpow2.f32 %v730_v8  ;;  %v727_v55 = vsub.f32 %v3792_v26, %v716_v10  ;;  %v1096_v5 = vmul.f32 1.442695, %v1088_v9 }
 0x2d5   : > { %v3834_v13 = vpop.eup %3373  ;;  %3379 = vpow2.f32 %v1092_v7  ;;  %v719_v28 = vpop.xlane.xlu1 %718 }
 0x2d6   : > { %v736_v17 = vmul.f32 1.442695, %v727_v55  ;;  %v745_v15 = vsel %vm704_vm4, %v3834_v13, 0.0  ;;  %v728_v33 = vsub.f32 %v3797_v31, %v719_v28 }
 0x2d7   : > { %v1079_v19 = vpop.xlane.xlu0 %1078  ;;  %746 = vadd.xlane.f32.xlu0 %v745_v15 }
 0x2d8   : > { %3381 = vpow2.f32 %v736_v17  ;;  %v1089_v11 = vsub.f32 %v1065_v34, %v1079_v19  ;;  %v738_v40 = vmul.f32 1.442695, %v728_v33 }
 0x2d9   : > { %3383 = vpow2.f32 %v1096_v5  ;;  %v1139_v60 = vpop.permute.xlu1 %1138 }
 0x2da   : > { %v1098_v21 = vmul.f32 1.442695, %v1089_v11 }
 0x2db   : > { %v713_v23 = vpop.xlane.xlu0 %712 }
 0x2dc   : > { %3385 = vpow2.f32 %v1098_v21  ;;  %v726_v24 = vsub.f32 %v700_v38, %v713_v23 }
 0x2dd   : > { %v3838_v25 = vpop.eup %3375 }
 0x2de   : > { %v734_v26 = vmul.f32 1.442695, %v726_v24  ;;  %v1107_v27 = vsel %vm704_vm4, %v3838_v25, 0.0 }
 0x2df   : > { %v723_v29 = vpop.xlane.xlu0 %722  ;;  %1108 = vadd.xlane.f32.xlu0 %v1107_v27 }
 0x2e0   : > { %3387 = vpow2.f32 %v734_v26  ;;  %v729_v30 = vsub.f32 %v3807_v43, %v723_v29 }
 0x2e1   : > { %v3843_v32 = vpop.eup %3377 }
 0x2e2   : > { %v740_v34 = vmul.f32 1.442695, %v729_v30  ;;  %v742_v35 = vsel %vm704_vm4, %v3843_v32, 0.0  ;;  %v3848_v36 = vpop.eup %3379 }
 0x2e3   : > { %v1085_v37 = vpop.xlane.xlu0 %1084  ;;  %743 = vadd.xlane.f32.xlu1 %v742_v35  ;;  %v1104_v31 = vsel %vm704_vm4, %v3848_v36, 0.0 }
 0x2e4   : > { %3389 = vpow2.f32 %v740_v34  ;;  %v1091_v38 = vsub.f32 %v3810_v47, %v1085_v37 }
 0x2e5   : > { %v3851_v39 = vpop.eup %3381 }
 0x2e6   : > { %v1102_v41 = vmul.f32 1.442695, %v1091_v38  ;;  %v751_v42 = vsel %vm704_vm4, %v3851_v39, 0.0  ;;  %v3857_v43 = vpop.eup %3383 }
 0x2e7   : > { %752 = vadd.xlane.f32.xlu0 %v751_v42  ;;  %1105 = vadd.xlane.f32.xlu1 %v1104_v31  ;;  %v1110_v47 = vsel %vm704_vm4, %v3857_v43, 0.0  ;;  %v1137_v2 = vpop.permute.xlu0 %1136 }
 0x2e8   : > { %3391 = vpow2.f32 %v1102_v41 }
 0x2e9   : > { %v3859_v44 = vpop.eup %3385  ;;  %3393 = vpow2.f32 %v738_v40 }
 0x2ea   : > { %v1113_v45 = vsel %vm704_vm4, %v3859_v44, 0.0 }
 0x2eb   : > { %1114 = vadd.xlane.f32.xlu1 %v1113_v45  ;;  %1111 = vadd.xlane.f32.xlu0 %v1110_v47  ;;  %v3912_v3 = vpop.permute.xlu0 %1327 }
 0x2ed   : > { %v3865_v48 = vpop.eup %3387 }
 0x2ee   : > { %v748_v51 = vsel %vm704_vm4, %v3865_v48, 0.0 }
 0x2ef   : > { %749 = vadd.xlane.f32.xlu1 %v748_v51 }
 0x2f1   : > { %v3869_v52 = vpop.eup %3389 }
 0x2f2   : > { %v757_v53 = vsel %vm720_vm5, %v3869_v52, 0.0 }
 0x2f3   : > { %758 = vadd.xlane.f32.xlu0 %v757_v53 }
 0x2f5   : > { %v3873_v54 = vpop.eup %3391 }
 0x2f6   : > { %v1119_v57 = vsel %vm720_vm5, %v3873_v54, 0.0  ;;  %v3877_v58 = vpop.eup %3393 }
 0x2f7   : > { %1120 = vadd.xlane.f32.xlu1 %v1119_v57  ;;  %v754_v59 = vsel %vm704_vm4, %v3877_v58, 0.0 }
 0x2fb   : > { %755 = vadd.xlane.f32.xlu1 %v754_v59 }
 0x309   : > { %1323 = vrot.lane.b32.xlu0 %v3678_v18, %s3550_s29 }
 0x30a   : > { %v1082_v61 = vpop.xlane.xlu1 %1081 }
 0x30b   : > { %v1090_v62 = vsub.f32 %v3823_v56, %v1082_v61 }
 0x30c   : > { %1325 = vrot.lane.b32.xlu1 %v3681_v20, %s3550_s29 }
 0x30d   : > { %v1100_v63 = vmul.f32 1.442695, %v1090_v62 }
 0x30e   : > { %v1135_v4 = vpop.permute.xlu1 %1134 }
 0x30f   : > { %3395 = vpow2.f32 %v1100_v63 }
 0x310   : > { %1321 = vrot.lane.b32.xlu1 %v3676_v16, %s3550_s29 }
 0x314   : > { %1317 = vrot.lane.b32.xlu1 %v3670_v12, %s3550_s29 }
 0x318   : > { %1307 = vrot.lane.b32.xlu1 %v3674_v14, %s3551_s30 }
 0x31c   : > { %1311 = vrot.lane.b32.xlu1 %v3678_v18, %s3551_s30  ;;  %v3893_v0 = vpop.eup %3395 }
 0x31d   : > { %v1116_v56 = vsel %vm704_vm4, %v3893_v0, 0.0 }
 0x320   : > { %1315 = vrot.lane.b32.xlu1 %v3684_v22, %s3551_s30 }
 0x324   : > { %1530 = vrot.lane.b32.xlu1 %v3684_v22, %s3552_s15 }
 0x328   : > { %1526 = vrot.lane.b32.xlu1 %v3678_v18, %s3552_s15  ;;  %1117 = vadd.xlane.f32.xlu0 %v1116_v56 }
 0x32c   : > { %1522 = vrot.lane.b32.xlu1 %v3674_v14, %s3552_s15 }
 0x330   : > { %1520 = vrot.lane.b32.xlu1 %v3670_v12, %s3552_s15 }
 0x334   : > { %1711 = vrot.lane.b32.xlu1 %v3681_v20, %s3553_s16 }
 0x33e   : > { %1319 = vrot.lane.b32.xlu0 %v3674_v14, %s3550_s29 }
 0x342   : > { %1305 = vrot.lane.b32.xlu0 %v3670_v12, %s3551_s30 }
 0x346   : > { %1309 = vrot.lane.b32.xlu0 %v3676_v16, %s3551_s30 }
 0x34a   : > { %1313 = vrot.lane.b32.xlu0 %v3681_v20, %s3551_s30 }
 0x34e   : > { %1528 = vrot.lane.b32.xlu0 %v3681_v20, %s3552_s15 }
 0x352   : > { %1524 = vrot.lane.b32.xlu0 %v3676_v16, %s3552_s15 }
 0x356   : > { %1713 = vrot.lane.b32.xlu0 %v3684_v22, %s3553_s16 }
 0x360   : > { %v747_v6 = vpop.xlane.xlu0 %746 }
 0x361   : > { %3397 = vrcp.f32 %v747_v6 }
 0x368   : > { %v1109_v9 = vpop.xlane.xlu0 %1108 }
 0x36c   : > { %v744_v7 = vpop.xlane.xlu1 %743 }
 0x36d   : > { %3399 = vrcp.f32 %v744_v7 }
 0x36e   : > { %v3398_v17 = vpop.eup %3397 }
 0x36f   : > { %v767_v11 = vmul.f32 %v3398_v17, %v3834_v13 }
 0x370   : > { %v1106_v8 = vpop.xlane.xlu1 %1105  ;;  %v753_v55 = vpop.xlane.xlu0 %752 }
 0x371   : > { %3401 = vrcp.f32 %v753_v55 }
 0x374   : > { %v1115_v10 = vpop.xlane.xlu1 %1114  ;;  %v1112_v21 = vpop.xlane.xlu0 %1111 }
 0x378   : > { %v750_v5 = vpop.xlane.xlu1 %749 }
 0x379   : > { %3403 = vrcp.f32 %v750_v5 }
 0x37a   : > { %v3400_v15 = vpop.eup %3399  ;;  %3405 = vrcp.f32 %v1106_v8 }
 0x37b   : > { %v766_v19 = vmul.f32 %v3400_v15, %v3843_v32 }
 0x37c   : > { %v759_v24 = vpop.xlane.xlu0 %758 }
 0x37d   : > { %3156 = vmatprep.mubr.msk.f32.mxu0 %vm704_vm4, %v766_v19  ;;  %3407 = vrcp.f32 %v759_v24  ;;  %v2918_v19 = vld [vmem:[%s3768_s28 + $0x68] sm:$0xff] }
 0x37e   : > { %3157 = vmatmul.mubr.msk.f32.vlgmr.msra.gmra.mxu0 %vm704_vm4, %v767_v11  ;;  %v3402_v26 = vpop.eup %3401 }
 0x37f   : > { %3187 = vmatpush3.msk.msra.mxu0 %vm807_vm3, %v3760_v50 }
 0x380   : > { %3188 = vmatprep.subr.mxu0 %v3753_v46  ;;  %v1121_v23 = vpop.xlane.xlu1 %1120 }
 0x381   : > { %3189 = vmatpush3.msra.mxu0 %v3753_v46  ;;  %v769_v46 = vmul.f32 %v3402_v26, %v3851_v39 }
 0x382   : > { %3190 = vmatprep.subr.mxu0 %v3758_v49 }
 0x383   : > { %3191 = vmatpush3.msra.mxu0 %v3758_v49 }
 0x384   : > { %3192 = vmatprep.subr.mxu0 %v1139_v60  ;;  %v756_v13 = vpop.xlane.xlu1 %755 }
 0x385   : > { %3193 = vmatpush3.msra.mxu0 %v1139_v60  ;;  %3409 = vrcp.f32 %v756_v13  ;;  %v2920_v13 = vld [vmem:[%s3768_s28 + $0x78] sm:$0xff] }
 0x386   : > { %v3404_v27 = vpop.eup %3403  ;;  %3194 = vmatprep.subr.mxu0 %v1137_v2  ;;  %3411 = vrcp.f32 %v1109_v9 }
 0x387   : > { %3195 = vmatpush3.msra.mxu0 %v1137_v2  ;;  %v768_v50 = vmul.f32 %v3404_v27, %v3865_v48  ;;  %3413 = vrcp.f32 %v1112_v21  ;;  %v3406_v29 = vpop.eup %3405  ;;  %v1324_v48 = vpop.permute.xlu0 %1323  ;;  %v2917_v21 = vld [vmem:[%s3768_s28 + $0x60] sm:$0xff] }
 0x388   : > { %3196 = vmatprep.subr.mxu0 %v1135_v4  ;;  %v1326_v28 = vpop.permute.xlu1 %1325  ;;  %3415 = vrcp.f32 %v1115_v10  ;;  %v1128_v39 = vmul.f32 %v3406_v29, %v3848_v36 }
 0x389   : > { %3197 = vmatpush3.msra.mxu0 %v1135_v4  ;;  %3159 = vmatprep.mubr.msk.f32.mxu0 %vm704_vm4, %v768_v50  ;;  %3417 = vrcp.f32 %v1121_v23 }
 0x38a   : > { %3207 = vmatprep.subr.msk.mxu0 %vm578_vm2, %v3912_v3  ;;  %3160 = vmatmul.mubr.msk.f32.gmra.mxu0 %vm704_vm4, %v769_v46  ;;  %v3408_v32 = vpop.eup %3407 }
 0x38b   : > { %v771_v37 = vmul.f32 %v3408_v32, %v3869_v52 }
 0x38c   : > { %v1322_v49 = vpop.permute.xlu1 %1321 }
 0x390   : > { %v1318_v30 = vpop.permute.xlu1 %1317 }
 0x392   : > { %v3410_v33 = vpop.eup %3409 }
 0x393   : > { %v770_v34 = vmul.f32 %v3410_v33, %v3877_v58  ;;  %v3412_v38 = vpop.eup %3411 }
 0x394   : > { %v1308_v35 = vpop.permute.xlu1 %1307  ;;  %v3414_v40 = vpop.eup %3413  ;;  %v1129_v41 = vmul.f32 %v3412_v38, %v3838_v25  ;;  %v2921_v38 = vld [vmem:[%s3768_s28 + $0x80] sm:$0xff] }
 0x395   : > { %3162 = vmatprep.mubr.msk.f32.mxu0 %vm704_vm4, %v770_v34  ;;  %v3416_v31 = vpop.eup %3415  ;;  %v1130_v45 = vmul.f32 %v3414_v40, %v3857_v43 }
 0x396   : > { %3163 = vmatmul.mubr.msk.f32.gmra.mxu0 %vm704_vm4, %v771_v37  ;;  %v1131_v47 = vmul.f32 %v3416_v31, %v3859_v44  ;;  %v3418_v53 = vpop.eup %3417 }
 0x397   : > { %3198 = vmatprep.mubr.msk.f32.mxu0 %vm704_vm4, %v1128_v39  ;;  %v1133_v61 = vmul.f32 %v3418_v53, %v3873_v54 }
 0x398   : > { %v1312_v42 = vpop.permute.xlu1 %1311 }
 0x39a   : > { %3199 = vmatmul.mubr.msk.f32.vlgmr.msra.gmra.mxu0 %vm704_vm4, %v1129_v41 }
 0x39b   : > { %3208 = vmatpush3.xpose.msk.msra.mxu0 %vm578_vm2, %v3912_v3  ;;  %3201 = vmatprep.mubr.msk.f32.mxu0 %vm704_vm4, %v1130_v45 }
 0x39c   : > { %3209 = vmatprep.subr.msk.mxu0 %vm578_vm2, %v1326_v28  ;;  %v1316_v36 = vpop.permute.xlu1 %1315 }
 0x39e   : > { %3202 = vmatmul.mubr.msk.f32.gmra.mxu0 %vm704_vm4, %v1131_v47 }
 0x39f   : > { %3210 = vmatpush3.xpose.msk.msra.mxu0 %vm578_vm2, %v1326_v28  ;;  %v2919_v28 = vld [vmem:[%s3768_s28 + $0x70] sm:$0xff] }
 0x3a0   : > { %3211 = vmatprep.subr.msk.mxu0 %vm578_vm2, %v1324_v48  ;;  %v1531_v25 = vpop.permute.xlu1 %1530 }
 0x3a1   : > { %3228 = vmatprep.subr.msk.mxu1 %vm807_vm3, %v1531_v25 }
 0x3a2   : > { %3229 = vmatpush3.msk.msra.mxu1 %vm807_vm3, %v1531_v25 }
 0x3a3   : > { %3212 = vmatpush3.xpose.msk.msra.mxu0 %vm578_vm2, %v1324_v48 }
 0x3a4   : > { %3213 = vmatprep.subr.msk.mxu0 %vm578_vm2, %v1322_v49  ;;  %v1527_v59 = vpop.permute.xlu1 %1526 }
 0x3a7   : > { %3214 = vmatpush3.xpose.msk.msra.mxu0 %vm578_vm2, %v1322_v49 }
 0x3a8   : > { %v1523_v63 = vpop.permute.xlu1 %1522 }
 0x3ac   : > { %v1521_v54 = vpop.permute.xlu1 %1520 }
 0x3b1   : > { %v1118_v43 = vpop.xlane.xlu0 %1117 }
 0x3b2   : > { %3419 = vrcp.f32 %v1118_v43  ;;  %v4003_v43 = vpop.permute.xlu1 %1711 }
 0x3b5   : > { %v1320_v44 = vpop.permute.xlu0 %1319 }
 0x3b6   : > { %3215 = vmatprep.subr.msk.mxu0 %vm578_vm2, %v1320_v44 }
 0x3b7   : > { %3216 = vmatpush3.xpose.msk.msra.mxu0 %vm578_vm2, %v1320_v44 }
 0x3b8   : > { %3217 = vmatprep.subr.msk.mxu0 %vm578_vm2, %v1318_v30 }
 0x3b9   : > { %v1306_v51 = vpop.permute.xlu0 %1305 }
 0x3bb   : > { %3218 = vmatpush3.xpose.msk.msra.mxu0 %vm578_vm2, %v1318_v30 }
 0x3bd   : > { %v1310_v52 = vpop.permute.xlu0 %1309 }
 0x3bf   : > { %v3420_v57 = vpop.eup %3419 }
 0x3c0   : > { %v1132_v58 = vmul.f32 %v3420_v57, %v3893_v0 }
 0x3c1   : > { %v1314_v60 = vpop.permute.xlu0 %1313 }
 0x3c2   : > { %3204 = vmatprep.mubr.msk.f32.mxu0 %vm704_vm4, %v1132_v58 }
 0x3c3   : > { %3205 = vmatmul.mubr.msk.f32.gmra.mxu0 %vm704_vm4, %v1133_v61 }
 0x3c4   : > { %3219 = vmatprep.mubr.msk.f32.mxu0 %vm578_vm2, %v1306_v51 }
 0x3c5   : > { %v1529_v62 = vpop.permute.xlu0 %1528 }
 0x3c6   : > { %3230 = vmatprep.subr.mxu1 %v1529_v62 }
 0x3c7   : > { %3220 = vmatmul.mubr.msk.f32.vlgmr.msra.gmra.mxu0 %vm578_vm2, %v1308_v35  ;;  %3231 = vmatpush3.msra.mxu1 %v1529_v62  ;;  %v2922_v35 = vld [vmem:[%s3768_s28 + $0x88] sm:$0xf] }
 0x3c8   : > { %3222 = vmatprep.mubr.msk.f32.mxu0 %vm578_vm2, %v1310_v52  ;;  %3232 = vmatprep.subr.mxu1 %v1527_v59 }
 0x3c9   : > { %v1525_v0 = vpop.permute.xlu0 %1524  ;;  %3233 = vmatpush3.msra.mxu1 %v1527_v59 }
 0x3ca   : > { %3234 = vmatprep.subr.mxu1 %v1525_v0 }
 0x3cb   : > { %3223 = vmatmul.mubr.msk.f32.gmra.mxu0 %vm578_vm2, %v1312_v42  ;;  %3235 = vmatpush3.msra.mxu1 %v1525_v0 }
 0x3cc   : > { %3225 = vmatprep.mubr.msk.f32.mxu0 %vm578_vm2, %v1314_v60  ;;  %3236 = vmatprep.subr.mxu1 %v1523_v63 }
 0x3cd   : > { %3237 = vmatpush3.msra.mxu1 %v1523_v63  ;;  %v3965_v56 = vpop.permute.xlu0 %1713 }
 0x3ce   : > { %3238 = vmatprep.subr.mxu1 %v1521_v54 }
 0x3cf   : > { %3226 = vmatmul.mubr.msk.f32.gmra.mxu0 %vm578_vm2, %v1316_v36  ;;  %3239 = vmatpush3.msra.mxu1 %v1521_v54 }
 0x3d0   : > { %3249 = vmatprep.subr.msk.mxu1 %vm578_vm2, %v3965_v56 }
 0x43e   : > { %v3158_v2 = vpop.f32.mrf.mxu0 }
 0x43f   : > { %906 = vst.msk [vmem:[#allocation2 + $0x8] sm:$0xff] %vm578_vm2, %v3158_v2 }
 0x440   : > { %v876_v3 = vpop.f32.mrf.mxu0 }
 0x441   : > { %905 = vst.msk [vmem:[#allocation2] sm:$0xff] %vm578_vm2, %v876_v3 }
 0x44a   : > { %v3161_v4 = vpop.f32.mrf.mxu0 }
 0x44b   : > { %908 = vst.msk [vmem:[#allocation2 + $0x18] sm:$0xff] %vm578_vm2, %v3161_v4 }
 0x44c   : > { %v886_v6 = vpop.f32.mrf.mxu0 }
 0x44d   : > { %907 = vst.msk [vmem:[#allocation2 + $0x10] sm:$0xff] %vm578_vm2, %v886_v6 }
 0x456   : > { %v3164_v7 = vpop.f32.mrf.mxu0 }
 0x457   : > { %911 = vst.msk [vmem:[#allocation2 + $0x28] sm:$0xf] %vm910_vm6, %v3164_v7 }
 0x458   : > { %v896_v8 = vpop.f32.mrf.mxu0 }
 0x459   : > { %909 = vst.msk [vmem:[#allocation2 + $0x20] sm:$0xff] %vm578_vm2, %v896_v8 }
 0x45a   : > { %v3975_v9 = vpop.f32.mrf.mxu0 }
 0x45c   : > { %v3977_v10 = vpop.f32.mrf.mxu0 }
 0x45e   : > { %v3979_v55 = vpop.f32.mrf.mxu0 }
 0x460   : > { %v3981_v5 = vpop.f32.mrf.mxu0 }
 0x483   : > { %v3983_v17 = vpop.f32.mrf.mxu0 }
 0x485   : > { %v3985_v15 = vpop.f32.mrf.mxu0 }
 0x487   : > { %v3221_v11 = vpop.f32.mrf.mxu0 }
 0x488   : > { %v1425_v23 = vadd.f32 %v3221_v11, %v2918_v19 }
 0x489   : > { %v1419_v24 = vpop.f32.mrf.mxu0 }
 0x48a   : > { %v1449_v26 = vmul.f32 0.17677669, %v1425_v23  ;;  %v1420_v27 = vadd.f32 %v2917_v21, %v1419_v24 }
 0x48b   : > { %v3224_v50 = vpop.f32.mrf.mxu0 }
 0x48c   : > { %v1448_v46 = vmul.f32 0.17677669, %v1420_v27  ;;  %v1435_v49 = vadd.f32 %v3224_v50, %v2920_v13  ;;  %v1457_v29 = vsel %vm704_vm4, %v1449_v26, -inf }
 0x48d   : > { %1458 = vmax.xlane.f32.xlu1 %v1457_v29  ;;  %v1429_v30 = vpop.f32.mrf.mxu0 }
 0x48e   : > { %v1451_v32 = vmul.f32 0.17677669, %v1435_v49  ;;  %v1430_v33 = vadd.f32 %v2919_v28, %v1429_v30  ;;  %v1454_v34 = vsel %vm704_vm4, %v1448_v46, -inf }
 0x48f   : > { %1455 = vmax.xlane.f32.xlu0 %v1454_v34  ;;  %v3227_v37 = vpop.f32.mrf.mxu0 }
 0x490   : > { %v1450_v40 = vmul.f32 0.17677669, %v1430_v33  ;;  %v1445_v41 = vadd.f32 %v3227_v37, %v2922_v35  ;;  %v1463_v31 = vsel %vm704_vm4, %v1451_v32, -inf }
 0x491   : > { %v1439_v39 = vpop.f32.mrf.mxu0 }
 0x492   : > { %v1440_v42 = vadd.f32 %v2921_v38, %v1439_v39  ;;  %v1453_v36 = vmul.f32 0.17677669, %v1445_v41  ;;  %v1460_v47 = vsel %vm704_vm4, %v1450_v40, -inf }
 0x493   : > { %1464 = vmax.xlane.f32.xlu0 %v1463_v31 }
 0x494   : > { %v1452_v45 = vmul.f32 0.17677669, %v1440_v42  ;;  %v1469_v25 = vsel %vm720_vm5, %v1453_v36, -inf }
 0x496   : > { %v1466_v48 = vsel %vm704_vm4, %v1452_v45, -inf }
 0x497   : > { %1461 = vmax.xlane.f32.xlu0 %v1460_v47  ;;  %1467 = vmax.xlane.f32.xlu1 %v1466_v48 }
 0x49b   : > { %1470 = vmax.xlane.f32.xlu0 %v1469_v25 }
 0x4a8   : > { %1707 = vrot.lane.b32.xlu1 %v3676_v16, %s3553_s16 }
 0x4b1   : > { %1709 = vrot.lane.b32.xlu0 %v3678_v18, %s3553_s16 }
 0x516   : > { %v1459_v44 = vpop.xlane.xlu1 %1458 }
 0x517   : > { %v1473_v51 = vsub.f32 %v1449_v26, %v1459_v44 }
 0x518   : > { %v1456_v52 = vpop.xlane.xlu0 %1455 }
 0x519   : > { %v1480_v53 = vmul.f32 1.442695, %v1473_v51  ;;  %v1472_v57 = vsub.f32 %v1448_v46, %v1456_v52 }
 0x51b   : > { %3421 = vpow2.f32 %v1480_v53  ;;  %v1478_v58 = vmul.f32 1.442695, %v1472_v57 }
 0x51c   : > { %v1465_v63 = vpop.xlane.xlu0 %1464 }
 0x51d   : > { %3423 = vpow2.f32 %v1478_v58  ;;  %v1475_v54 = vsub.f32 %v1451_v32, %v1465_v63 }
 0x51f   : > { %v1484_v6 = vmul.f32 1.442695, %v1475_v54 }
 0x520   : > { %v1462_v0 = vpop.xlane.xlu0 %1461  ;;  %v1468_v4 = vpop.xlane.xlu1 %1467 }
 0x521   : > { %v1474_v3 = vsub.f32 %v1450_v40, %v1462_v0  ;;  %v1476_v19 = vsub.f32 %v1452_v45, %v1468_v4  ;;  %3425 = vpow2.f32 %v1484_v6  ;;  %v2942_v4 = vld [vmem:[%s3768_s28 + $0x90] sm:$0xff] }
 0x523   : > { %v1482_v8 = vmul.f32 1.442695, %v1474_v3  ;;  %v1486_v21 = vmul.f32 1.442695, %v1476_v19 }
 0x524   : > { %v1471_v2 = vpop.xlane.xlu0 %1470  ;;  %v1708_v29 = vpop.permute.xlu1 %1707 }
 0x525   : > { %v1477_v7 = vsub.f32 %v1453_v36, %v1471_v2  ;;  %3427 = vpow2.f32 %v1482_v8  ;;  %v2943_v2 = vld [vmem:[%s3768_s28 + $0x98] sm:$0xff] }
 0x527   : > { %v1488_v11 = vmul.f32 1.442695, %v1477_v7 }
 0x528   : > { %v3422_v59 = vpop.eup %3421  ;;  %v1710_v49 = vpop.permute.xlu0 %1709 }
 0x529   : > { %v1493_v60 = vsel %vm704_vm4, %v3422_v59, 0.0  ;;  %3429 = vpow2.f32 %v1488_v11  ;;  %v2945_v11 = vld [vmem:[%s3768_s28 + $0xa8] sm:$0xff] }
 0x52a   : > { %v3424_v61 = vpop.eup %3423  ;;  %1494 = vadd.xlane.f32.xlu0 %v1493_v60  ;;  %3431 = vpow2.f32 %v1486_v21 }
 0x52b   : > { %v1490_v62 = vsel %vm704_vm4, %v3424_v61, 0.0 }
 0x52c   : > { %1491 = vadd.xlane.f32.xlu1 %v1490_v62 }
 0x52e   : > { %v3426_v23 = vpop.eup %3425 }
 0x52f   : > { %v1499_v13 = vsel %vm704_vm4, %v3426_v23, 0.0 }
 0x532   : > { %v3428_v24 = vpop.eup %3427 }
 0x533   : > { %v1496_v27 = vsel %vm704_vm4, %v3428_v24, 0.0 }
 0x536   : > { %v3430_v26 = vpop.eup %3429 }
 0x537   : > { %v3432_v50 = vpop.eup %3431  ;;  %v1505_v28 = vsel %vm720_vm5, %v3430_v26, 0.0 }
 0x538   : > { %v1502_v46 = vsel %vm704_vm4, %v3432_v50, 0.0 }
 0x53d   : > { %1703 = vrot.lane.b32.xlu1 %v3670_v12, %s3553_s16 }
 0x540   : > { %1705 = vrot.lane.b32.xlu0 %v3674_v14, %s3553_s16 }
 0x55f   : > { %1500 = vadd.xlane.f32.xlu0 %v1499_v13 }
 0x561   : > { %1497 = vadd.xlane.f32.xlu1 %v1496_v27 }
 0x563   : > { %1506 = vadd.xlane.f32.xlu0 %v1505_v28 }
 0x565   : > { %1503 = vadd.xlane.f32.xlu1 %v1502_v46  ;;  %v2947_v46 = vld [vmem:[%s3768_s28 + $0xb8] sm:$0xf] }
 0x576   : > { %1693 = vrot.lane.b32.xlu1 %v3674_v14, %s3554_s18 }
 0x579   : > { %1691 = vrot.lane.b32.xlu0 %v3670_v12, %s3554_s18 }
 0x57a   : > { %1697 = vrot.lane.b32.xlu1 %v3678_v18, %s3554_s18 }
 0x57d   : > { %1695 = vrot.lane.b32.xlu0 %v3676_v16, %s3554_s18 }
 0x57e   : > { %1701 = vrot.lane.b32.xlu1 %v3684_v22, %s3554_s18 }
 0x581   : > { %1699 = vrot.lane.b32.xlu0 %v3681_v20, %s3554_s18 }
 0x5b3   : > { %v1495_v30 = vpop.xlane.xlu0 %1494 }
 0x5b4   : > { %3433 = vrcp.f32 %v1495_v30 }
 0x5b5   : > { %v1492_v32 = vpop.xlane.xlu1 %1491 }
 0x5b6   : > { %3435 = vrcp.f32 %v1492_v32 }
 0x5b7   : > { %v1706_v38 = vpop.permute.xlu0 %1705 }
 0x5b9   : > { %v1704_v39 = vpop.permute.xlu1 %1703 }
 0x5c1   : > { %v3434_v33 = vpop.eup %3433 }
 0x5c2   : > { %v1515_v37 = vmul.f32 %v3434_v33, %v3422_v59 }
 0x5c3   : > { %v3436_v34 = vpop.eup %3435 }
 0x5c4   : > { %v1514_v35 = vmul.f32 %v3436_v34, %v3424_v61 }
 0x5c6   : > { %3240 = vmatprep.mubr.msk.f32.mxu1 %vm704_vm4, %v1514_v35 }
 0x5c7   : > { %3241 = vmatmul.mubr.msk.f32.vlgmr.msra.gmra.mxu1 %vm704_vm4, %v1515_v37 }
 0x5c8   : > { %3250 = vmatpush3.xpose.msk.msra.mxu1 %vm578_vm2, %v3965_v56 }
 0x5c9   : > { %3251 = vmatprep.subr.msk.mxu1 %vm578_vm2, %v4003_v43 }
 0x5cc   : > { %3252 = vmatpush3.xpose.msk.msra.mxu1 %vm578_vm2, %v4003_v43 }
 0x5cd   : > { %3253 = vmatprep.subr.msk.mxu1 %vm578_vm2, %v1710_v49 }
 0x5d0   : > { %3254 = vmatpush3.xpose.msk.msra.mxu1 %vm578_vm2, %v1710_v49 }
 0x5d1   : > { %3255 = vmatprep.subr.msk.mxu1 %vm578_vm2, %v1708_v29 }
 0x5d4   : > { %3256 = vmatpush3.xpose.msk.msra.mxu1 %vm578_vm2, %v1708_v29 }
 0x5d5   : > { %3257 = vmatprep.subr.msk.mxu1 %vm578_vm2, %v1706_v38 }
 0x5d8   : > { %3258 = vmatpush3.xpose.msk.msra.mxu1 %vm578_vm2, %v1706_v38 }
 0x5d9   : > { %3259 = vmatprep.subr.msk.mxu1 %vm578_vm2, %v1704_v39 }
 0x5dc   : > { %3260 = vmatpush3.xpose.msk.msra.mxu1 %vm578_vm2, %v1704_v39  ;;  %v2946_v39 = vld [vmem:[%s3768_s28 + $0xb0] sm:$0xff] }
 0x5dd   : > { %3307 = vmatprep.subr.bf16.mxu1 %v3543_v1 }
 0x5e8   : > { %v1501_v56 = vpop.xlane.xlu0 %1500 }
 0x5e9   : > { %3437 = vrcp.f32 %v1501_v56 }
 0x5ea   : > { %v1498_v40 = vpop.xlane.xlu1 %1497 }
 0x5eb   : > { %3439 = vrcp.f32 %v1498_v40 }
 0x5ec   : > { %v1507_v41 = vpop.xlane.xlu0 %1506 }
 0x5ed   : > { %3441 = vrcp.f32 %v1507_v41 }
 0x5ee   : > { %v1504_v42 = vpop.xlane.xlu1 %1503 }
 0x5ef   : > { %3443 = vrcp.f32 %v1504_v42 }
 0x5f0   : > { %v1692_v43 = vpop.permute.xlu0 %1691 }
 0x5f2   : > { %v1694_v52 = vpop.permute.xlu1 %1693 }
 0x5f4   : > { %v1696_v53 = vpop.permute.xlu0 %1695 }
 0x5f6   : > { %v3438_v31 = vpop.eup %3437  ;;  %v1698_v57 = vpop.permute.xlu1 %1697 }
 0x5f7   : > { %v1517_v47 = vmul.f32 %v3438_v31, %v3426_v23  ;;  %v2944_v23 = vld [vmem:[%s3768_s28 + $0xa0] sm:$0xff] }
 0x5f8   : > { %v3440_v45 = vpop.eup %3439  ;;  %v1700_v58 = vpop.permute.xlu0 %1699 }
 0x5f9   : > { %v1516_v36 = vmul.f32 %v3440_v45, %v3428_v24 }
 0x5fa   : > { %v3442_v48 = vpop.eup %3441  ;;  %v1702_v59 = vpop.permute.xlu1 %1701 }
 0x5fb   : > { %3243 = vmatprep.mubr.msk.f32.mxu1 %vm704_vm4, %v1516_v36  ;;  %v1519_v51 = vmul.f32 %v3442_v48, %v3430_v26 }
 0x5fc   : > { %v3444_v25 = vpop.eup %3443  ;;  %3244 = vmatmul.mubr.msk.f32.gmra.mxu1 %vm704_vm4, %v1517_v47 }
 0x5fd   : > { %v1518_v44 = vmul.f32 %v3444_v25, %v3432_v50 }
 0x5ff   : > { %3246 = vmatprep.mubr.msk.f32.mxu1 %vm704_vm4, %v1518_v44 }
 0x600   : > { %3247 = vmatmul.mubr.msk.f32.gmra.mxu1 %vm704_vm4, %v1519_v51 }
 0x601   : > { %3261 = vmatprep.mubr.msk.f32.mxu1 %vm578_vm2, %v1692_v43 }
 0x604   : > { %3262 = vmatmul.mubr.msk.f32.vlgmr.msra.gmra.mxu1 %vm578_vm2, %v1694_v52 }
 0x605   : > { %3264 = vmatprep.mubr.msk.f32.mxu1 %vm578_vm2, %v1696_v53 }
 0x608   : > { %3265 = vmatmul.mubr.msk.f32.gmra.mxu1 %vm578_vm2, %v1698_v57 }
 0x609   : > { %3267 = vmatprep.mubr.msk.f32.mxu1 %vm578_vm2, %v1700_v58 }
 0x60c   : > { %3268 = vmatmul.mubr.msk.f32.gmra.mxu1 %vm578_vm2, %v1702_v59 }
 0x60d   : > { %3323 = vmatprep.mubr.msk.bf16.mxu1 %vm3544_vm0, %v3543_v1 }
 0x687   : > { %v4050_v60 = vpop.f32.mrf.mxu1 }
 0x689   : > { %v4052_v61 = vpop.f32.mrf.mxu1 }
 0x6bc   : > { %v4054_v62 = vpop.f32.mrf.mxu1 }
 0x6be   : > { %v4056_v63 = vpop.f32.mrf.mxu1 }
 0x6c0   : > { %v4058_v0 = vpop.f32.mrf.mxu1 }
 0x6c2   : > { %v4060_v54 = vpop.f32.mrf.mxu1 }
 0x6c4   : > { %v3263_v3 = vpop.f32.mrf.mxu1 }
 0x6c5   : > { %v1811_v6 = vadd.f32 %v3263_v3, %v2943_v2 }
 0x6c6   : > { %v1805_v7 = vpop.f32.mrf.mxu1 }
 0x6c7   : > { %v1835_v8 = vmul.f32 0.17677669, %v1811_v6  ;;  %v1806_v19 = vadd.f32 %v2942_v4, %v1805_v7 }
 0x6c8   : > { %v3266_v21 = vpop.f32.mrf.mxu1 }
 0x6c9   : > { %v1834_v24 = vmul.f32 0.17677669, %v1806_v19  ;;  %v1843_v13 = vsel %vm704_vm4, %v1835_v8, -inf  ;;  %v1821_v27 = vadd.f32 %v3266_v21, %v2945_v11 }
 0x6ca   : > { %1844 = vmax.xlane.f32.xlu1 %v1843_v13  ;;  %v1815_v26 = vpop.f32.mrf.mxu1 }
 0x6cb   : > { %v1816_v50 = vadd.f32 %v2944_v23, %v1815_v26  ;;  %v1840_v28 = vsel %vm704_vm4, %v1834_v24, -inf  ;;  %v1837_v30 = vmul.f32 0.17677669, %v1821_v27 }
 0x6cc   : > { %1841 = vmax.xlane.f32.xlu0 %v1840_v28  ;;  %v3269_v49 = vpop.f32.mrf.mxu1 }
 0x6cd   : > { %v1836_v29 = vmul.f32 0.17677669, %v1816_v50  ;;  %v1831_v32 = vadd.f32 %v3269_v49, %v2947_v46  ;;  %v1849_v35 = vsel %vm704_vm4, %v1837_v30, -inf }
 0x6ce   : > { %v1825_v38 = vpop.f32.mrf.mxu1 }
 0x6cf   : > { %v1846_v33 = vsel %vm704_vm4, %v1836_v29, -inf  ;;  %v1839_v34 = vmul.f32 0.17677669, %v1831_v32  ;;  %v1826_v56 = vadd.f32 %v2946_v39, %v1825_v38 }
 0x6d0   : > { %1847 = vmax.xlane.f32.xlu0 %v1846_v33 }
 0x6d1   : > { %v1855_v37 = vsel %vm720_vm5, %v1839_v34, -inf  ;;  %v1838_v40 = vmul.f32 0.17677669, %v1826_v56 }
 0x6d3   : > { %v1852_v41 = vsel %vm704_vm4, %v1838_v40, -inf }
 0x6d4   : > { %1850 = vmax.xlane.f32.xlu0 %v1849_v35 }
 0x6d8   : > { %1856 = vmax.xlane.f32.xlu0 %v1855_v37 }
 0x6db   : > { %1916 = vrot.lane.b32.xlu1 %v3684_v22, %s3555_s19 }
 0x6ee   : > { %1914 = vrot.lane.b32.xlu0 %v3681_v20, %s3555_s19 }
 0x6ff   : > { %1853 = vmax.xlane.f32.xlu1 %v1852_v41 }
 0x710   : > { %1912 = vrot.lane.b32.xlu1 %v3678_v18, %s3555_s19 }
 0x714   : > { %1910 = vrot.lane.b32.xlu1 %v3676_v16, %s3555_s19 }
 0x753   : > { %v1845_v42 = vpop.xlane.xlu1 %1844 }
 0x754   : > { %v1859_v31 = vsub.f32 %v1835_v8, %v1845_v42 }
 0x755   : > { %v1842_v45 = vpop.xlane.xlu0 %1841 }
 0x756   : > { %v1866_v22 = vmul.f32 1.442695, %v1859_v31  ;;  %v1858_v36 = vsub.f32 %v1834_v24, %v1842_v45 }
 0x757   : > { %v1917_v47 = vpop.permute.xlu1 %1916 }
 0x758   : > { %3445 = vpow2.f32 %v1866_v22  ;;  %v1864_v20 = vmul.f32 1.442695, %v1858_v36  ;;  %3270 = vmatprep.subr.msk.mxu0 %vm807_vm3, %v1917_v47 }
 0x759   : > { %v1848_v48 = vpop.xlane.xlu0 %1847  ;;  %3271 = vmatpush3.msk.msra.mxu0 %vm807_vm3, %v1917_v47 }
 0x75a   : > { %3447 = vpow2.f32 %v1864_v20  ;;  %v1860_v25 = vsub.f32 %v1836_v29, %v1848_v48 }
 0x75c   : > { %v1868_v43 = vmul.f32 1.442695, %v1860_v25 }
 0x75d   : > { %v1851_v18 = vpop.xlane.xlu0 %1850 }
 0x75e   : > { %3449 = vpow2.f32 %v1868_v43  ;;  %v1861_v44 = vsub.f32 %v1837_v30, %v1851_v18 }
 0x760   : > { %v1870_v16 = vmul.f32 1.442695, %v1861_v44 }
 0x761   : > { %v1857_v51 = vpop.xlane.xlu0 %1856 }
 0x762   : > { %3451 = vpow2.f32 %v1870_v16  ;;  %v1863_v52 = vsub.f32 %v1839_v34, %v1857_v51 }
 0x764   : > { %v1874_v53 = vmul.f32 1.442695, %v1863_v52 }
 0x765   : > { %v4084_v57 = vpop.eup %3445  ;;  %v1915_v58 = vpop.permute.xlu0 %1914 }
 0x766   : > { %3453 = vpow2.f32 %v1874_v53  ;;  %3272 = vmatprep.subr.mxu0 %v1915_v58  ;;  %v1879_v59 = vsel %vm704_vm4, %v4084_v57, 0.0 }
 0x767   : > { %v3448_v2 = vpop.eup %3447  ;;  %1880 = vadd.xlane.f32.xlu0 %v1879_v59  ;;  %3273 = vmatpush3.msra.mxu0 %v1915_v58 }
 0x768   : > { %v1876_v3 = vsel %vm704_vm4, %v3448_v2, 0.0 }
 0x769   : > { %1877 = vadd.xlane.f32.xlu1 %v1876_v3 }
 0x76b   : > { %v4089_v4 = vpop.eup %3449 }
 0x76c   : > { %v1882_v6 = vsel %vm704_vm4, %v4089_v4, 0.0 }
 0x76d   : > { %1883 = vadd.xlane.f32.xlu1 %v1882_v6 }
 0x76f   : > { %v4093_v7 = vpop.eup %3451 }
 0x770   : > { %v1885_v8 = vsel %vm704_vm4, %v4093_v7, 0.0 }
 0x771   : > { %1886 = vadd.xlane.f32.xlu0 %v1885_v8 }
 0x773   : > { %v4097_v19 = vpop.eup %3453 }
 0x774   : > { %v1891_v11 = vsel %vm720_vm5, %v4097_v19, 0.0 }
 0x775   : > { %1892 = vadd.xlane.f32.xlu0 %v1891_v11 }
 0x788   : > { %v1854_v21 = vpop.xlane.xlu1 %1853 }
 0x789   : > { %v1862_v23 = vsub.f32 %v1838_v40, %v1854_v21 }
 0x78b   : > { %v1872_v24 = vmul.f32 1.442695, %v1862_v23  ;;  %1908 = vrot.lane.b32.xlu0 %v3674_v14, %s3555_s19 }
 0x78c   : > { %v1913_v13 = vpop.permute.xlu1 %1912 }
 0x78d   : > { %3455 = vpow2.f32 %v1872_v24  ;;  %3274 = vmatprep.subr.mxu0 %v1913_v13 }
 0x78e   : > { %3275 = vmatpush3.msra.mxu0 %v1913_v13 }
 0x78f   : > { %1272 = vrot.lane.b32.xlu0 %v3977_v10, %s3556_s20 }
 0x790   : > { %v1911_v26 = vpop.permute.xlu1 %1910 }
 0x791   : > { %3276 = vmatprep.subr.mxu0 %v1911_v26 }
 0x792   : > { %3277 = vmatpush3.msra.mxu0 %v1911_v26 }
 0x793   : > { %1658 = vrot.lane.b32.xlu0 %v4052_v61, %s3557_s21 }
 0x797   : > { %1276 = vrot.lane.b32.xlu0 %v3981_v5, %s3556_s20 }
 0x79a   : > { %v3456_v27 = vpop.eup %3455 }
 0x79b   : > { %1662 = vrot.lane.b32.xlu0 %v4056_v63, %s3557_s21  ;;  %v1888_v14 = vsel %vm704_vm4, %v3456_v27, 0.0 }
 0x79c   : > { %1889 = vadd.xlane.f32.xlu1 %v1888_v14 }
 0x7ad   : > { %1906 = vrot.lane.b32.xlu1 %v3670_v12, %s3555_s19  ;;  %s4387_s19 = scalar_lea.vmem %s4417_s13, %s3335_s14 }
 0x7b1   : > { %1274 = vrot.lane.b32.xlu1 %v3975_v9, %s3556_s20 }
 0x7b5   : > { %1660 = vrot.lane.b32.xlu1 %v4050_v60, %s3557_s21 }
 0x7b9   : > { %1278 = vrot.lane.b32.xlu1 %v3979_v55, %s3556_s20 }
 0x7bd   : > { %1664 = vrot.lane.b32.xlu1 %v4054_v62, %s3557_s21 }
 0x7f0   : > { %v1881_v5 = vpop.xlane.xlu0 %1880 }
 0x7f2   : > { %v1878_v10 = vpop.xlane.xlu1 %1877 }
 0x7f3   : > { %3457 = vrcp.f32 %v1878_v10 }
 0x7f4   : > { %3459 = vrcp.f32 %v1881_v5 }
 0x7f6   : > { %v1884_v46 = vpop.xlane.xlu1 %1883 }
 0x7f7   : > { %3461 = vrcp.f32 %v1884_v46 }
 0x7fa   : > { %v1887_v61 = vpop.xlane.xlu0 %1886 }
 0x7fb   : > { %3463 = vrcp.f32 %v1887_v61 }
 0x7fe   : > { %v1893_v63 = vpop.xlane.xlu0 %1892 }
 0x7ff   : > { %3465 = vrcp.f32 %v1893_v63 }
 0x800   : > { %v3458_v50 = vpop.eup %3457 }
 0x801   : > { %v1900_v28 = vmul.f32 %v3458_v50, %v3448_v2  ;;  %v3460_v29 = vpop.eup %3459 }
 0x802   : > { %v1909_v12 = vpop.permute.xlu0 %1908  ;;  %v1901_v33 = vmul.f32 %v3460_v29, %v4084_v57 }
 0x803   : > { %3278 = vmatprep.subr.mxu0 %v1909_v12  ;;  %3282 = vmatprep.mubr.msk.f32.mxu0 %vm704_vm4, %v1900_v28 }
 0x804   : > { %3279 = vmatpush3.msra.mxu0 %v1909_v12  ;;  %v3462_v30 = vpop.eup %3461 }
 0x805   : > { %v1902_v35 = vmul.f32 %v3462_v30, %v4089_v4 }
 0x806   : > { %v1273_v9 = vpop.permute.xlu0 %1272 }
 0x807   : > { %1291 = vst.msk [vmem:[#allocation2] sm:$0xff] %vm1290_vm7, %v1273_v9 }
 0x808   : > { %v3464_v34 = vpop.eup %3463 }
 0x809   : > { %v1903_v38 = vmul.f32 %v3464_v34, %v4093_v7 }
 0x80a   : > { %v1659_v55 = vpop.permute.xlu0 %1658 }
 0x80b   : > { %1677 = vst.msk [vmem:[#allocation2] sm:$0xff] %vm1676_vm8, %v1659_v55 }
 0x80c   : > { %v3466_v56 = vpop.eup %3465 }
 0x80d   : > { %v1905_v31 = vmul.f32 %v3466_v56, %v4097_v19 }
 0x80e   : > { %v1277_v60 = vpop.permute.xlu0 %1276 }
 0x80f   : > { %1293 = vst.msk [vmem:[#allocation2 + $0x10] sm:$0xff] %vm1290_vm7, %v1277_v60 }
 0x812   : > { %v1663_v62 = vpop.permute.xlu0 %1662 }
 0x813   : > { %1679 = vst.msk [vmem:[#allocation2 + $0x10] sm:$0xff] %vm1676_vm8, %v1663_v62 }
 0x825   : > { %v1890_v49 = vpop.xlane.xlu1 %1889 }
 0x826   : > { %3467 = vrcp.f32 %v1890_v49 }
 0x829   : > { %v1907_v32 = vpop.permute.xlu1 %1906 }
 0x82a   : > { %3280 = vmatprep.subr.mxu0 %v1907_v32 }
 0x82b   : > { %3281 = vmatpush3.msra.mxu0 %v1907_v32 }
 0x82c   : > { %3283 = vmatmul.mubr.msk.f32.vlgmr.msra.gmra.mxu0 %vm704_vm4, %v1901_v33  ;;  %3291 = vmatprep.subr.bf16.mxu0 %v3543_v1 }
 0x82d   : > { %3285 = vmatprep.mubr.msk.f32.mxu0 %vm704_vm4, %v1902_v35  ;;  %v1275_v37 = vpop.permute.xlu1 %1274 }
 0x82e   : > { %1292 = vst.msk [vmem:[#allocation2 + $0x8] sm:$0xff] %vm1290_vm7, %v1275_v37 }
 0x830   : > { %3286 = vmatmul.mubr.msk.f32.gmra.mxu0 %vm704_vm4, %v1903_v38 }
 0x831   : > { %v1661_v39 = vpop.permute.xlu1 %1660 }
 0x832   : > { %1678 = vst.msk [vmem:[#allocation2 + $0x8] sm:$0xff] %vm1676_vm8, %v1661_v39 }
 0x833   : > { %v3468_v40 = vpop.eup %3467 }
 0x834   : > { %v1904_v41 = vmul.f32 %v3468_v40, %v3456_v27 }
 0x835   : > { %v1279_v42 = vpop.permute.xlu1 %1278 }
 0x836   : > { %1294 = vst.msk [vmem:[#allocation2 + $0x18] sm:$0xff] %vm1290_vm7, %v1279_v42  ;;  %3288 = vmatprep.mubr.msk.f32.mxu0 %vm704_vm4, %v1904_v41 }
 0x837   : > { %3289 = vmatmul.mubr.msk.f32.gmra.mxu0 %vm704_vm4, %v1905_v31 }
 0x838   : > { %3295 = vmatprep.mubr.msk.bf16.mxu0 %vm3544_vm0, %v3543_v1 }
 0x839   : > { %v1665_v45 = vpop.permute.xlu1 %1664 }
 0x83a   : > { %1680 = vst.msk [vmem:[#allocation2 + $0x18] sm:$0xff] %vm1676_vm8, %v1665_v45 }
 0x8ec   : > { %v3284_v22 = vpop.f32.mrf.mxu0 }
 0x8ed   : > { %2046 = vrot.lane.b32.xlu1 %v3284_v22, %s3558_s22 }
 0x8ee   : > { %v2009_v36 = vpop.f32.mrf.mxu0 }
 0x8ef   : > { %2044 = vrot.lane.b32.xlu0 %v2009_v36, %s3558_s22 }
 0x8f0   : > { %v3287_v47 = vpop.f32.mrf.mxu0 }
 0x8f1   : > { %1282 = vrot.lane.b32.xlu1 %v3983_v17, %s3556_s20 }
 0x8f2   : > { %v2019_v20 = vpop.f32.mrf.mxu0 }
 0x8f3   : > { %1280 = vrot.lane.b32.xlu0 %v3985_v15, %s3556_s20 }
 0x8f5   : > { %2050 = vrot.lane.b32.xlu1 %v3287_v47, %s3558_s22 }
 0x8f7   : > { %2048 = vrot.lane.b32.xlu0 %v2019_v20, %s3558_s22  ;;  %v3290_v48 = vpop.f32.mrf.mxu0 }
 0x8f9   : > { %1668 = vrot.lane.b32.xlu1 %v4058_v0, %s3557_s21  ;;  %v2029_v25 = vpop.f32.mrf.mxu0 }
 0x8fb   : > { %1666 = vrot.lane.b32.xlu0 %v4060_v54, %s3557_s21 }
 0x8fd   : > { %2054 = vrot.lane.b32.xlu1 %v3290_v48, %s3558_s22 }
 0x8ff   : > { %2052 = vrot.lane.b32.xlu0 %v2029_v25, %s3558_s22 }
 0x95f   : > { %v2047_v43 = vpop.permute.xlu1 %2046 }
 0x960   : > { %2064 = vst.msk [vmem:[#allocation2 + $0x8] sm:$0xff] %vm2062_vm9, %v2047_v43 }
 0x961   : > { %v2045_v17 = vpop.permute.xlu0 %2044 }
 0x962   : > { %2063 = vst.msk [vmem:[#allocation2] sm:$0xff] %vm2062_vm9, %v2045_v17 }
 0x963   : > { %v1283_v15 = vpop.permute.xlu1 %1282 }
 0x964   : > { %1297 = vst.msk [vmem:[#allocation2 + $0x28] sm:$0xf] %vm1296_vm10, %v1283_v15 }
 0x965   : > { %v1281_v18 = vpop.permute.xlu0 %1280 }
 0x966   : > { %1295 = vst.msk [vmem:[#allocation2 + $0x20] sm:$0xff] %vm1290_vm7, %v1281_v18 }
 0x967   : > { %v2051_v0 = vpop.permute.xlu1 %2050  ;;  %v2071_v44 = vld [vmem:[#allocation2 + $0x8] sm:$0xff] }
 0x968   : > { %2066 = vst.msk [vmem:[#allocation2 + $0x18] sm:$0xff] %vm2062_vm9, %v2051_v0  ;;  %v2081_v54 = vsel %vm487_vm1, %v2071_v44, 0.0  ;;  %v2967_v0 = vld [vmem:[%s4407_s3] ss:$0 sm:$0xff] }
 0x969   : > { %v2049_v16 = vpop.permute.xlu0 %2048  ;;  %2082 = vadd.xlane.f32.xlu1 %v2081_v54  ;;  %v2070_v51 = vld [vmem:[#allocation2] sm:$0xff] }
 0x96a   : > { %2065 = vst.msk [vmem:[#allocation2 + $0x10] sm:$0xff] %vm2062_vm9, %v2049_v16  ;;  %v2078_v52 = vsel %vm487_vm1, %v2070_v51, 0.0 }
 0x96b   : > { %2079 = vadd.xlane.f32.xlu0 %v2078_v52  ;;  %v1669_v53 = vpop.permute.xlu1 %1668  ;;  %v2968_v52 = vld [vmem:[%s4408_s4] ss:$0 sm:$0xff] }
 0x96c   : > { %1683 = vst.msk [vmem:[#allocation2 + $0x28] sm:$0xf] %vm1682_vm11, %v1669_v53 }
 0x96d   : > { %v1667_v57 = vpop.permute.xlu0 %1666 }
 0x96e   : > { %1681 = vst.msk [vmem:[#allocation2 + $0x20] sm:$0xff] %vm1676_vm8, %v1667_v57 }
 0x96f   : > { %v2055_v58 = vpop.permute.xlu1 %2054  ;;  %v2073_v4 = vld [vmem:[#allocation2 + $0x18] sm:$0xff] }
 0x970   : > { %2069 = vst.msk [vmem:[#allocation2 + $0x28] sm:$0xf] %vm2068_vm12, %v2055_v58  ;;  %v2087_v6 = vsel %vm487_vm1, %v2073_v4, 0.0 }
 0x971   : > { %v2053_v59 = vpop.permute.xlu0 %2052  ;;  %v2072_v2 = vld [vmem:[#allocation2 + $0x10] sm:$0xff] }
 0x972   : > { %2067 = vst.msk [vmem:[#allocation2 + $0x20] sm:$0xff] %vm2062_vm9, %v2053_v59  ;;  %v2084_v3 = vsel %vm487_vm1, %v2072_v2, 0.0 }
 0x973   : > { %2085 = vadd.xlane.f32.xlu0 %v2084_v3 }
 0x977   : > { %2088 = vadd.xlane.f32.xlu0 %v2087_v6  ;;  %v2075_v7 = vld [vmem:[#allocation2 + $0x28] sm:$0xf] }
 0x978   : > { %v2094_v11 = vsel %vm2093_vm13, %v2075_v7, 0.0 }
 0x979   : > { %v2074_v8 = vld [vmem:[#allocation2 + $0x20] sm:$0xff] }
 0x97a   : > { %v2090_v19 = vsel %vm487_vm1, %v2074_v8, 0.0 }
 0x97b   : > { %2091 = vadd.xlane.f32.xlu1 %v2090_v19  ;;  %2095 = vadd.xlane.f32.xlu0 %v2094_v11  ;;  %v3530_v19 = vld [vmem:[%s3655_s17] sm:$0xff] }
 0x9f2   : > { %v2083_v21 = vpop.xlane.xlu1 %2082 }
 0x9f3   : > { %v2099_v23 = vmul.f32 0.03125, %v2083_v21 }
 0x9f4   : > { %v2080_v24 = vpop.xlane.xlu0 %2079 }
 0x9f5   : > { %v2105_v13 = vsub.f32 %v2071_v44, %v2099_v23  ;;  %v2098_v26 = vmul.f32 0.03125, %v2080_v24 }
 0x9f7   : > { %v2104_v27 = vsub.f32 %v2070_v51, %v2098_v26  ;;  %v2111_v14 = vmul.f32 %v2105_v13, %v2105_v13 }
 0x9f9   : > { %v2119_v10 = vsel %vm487_vm1, %v2111_v14, 0.0  ;;  %v2110_v5 = vmul.f32 %v2104_v27, %v2104_v27 }
 0x9fa   : > { %2120 = vadd.xlane.f32.xlu0 %v2119_v10  ;;  %v3531_v10 = vld [vmem:[%s3655_s17 + $0x10] sm:$0xff] }
 0x9fb   : > { %v2116_v61 = vsel %vm487_vm1, %v2110_v5, 0.0 }
 0x9fc   : > { %v2086_v63 = vpop.xlane.xlu0 %2085  ;;  %2117 = vadd.xlane.f32.xlu1 %v2116_v61 }
 0x9fd   : > { %v2100_v50 = vmul.f32 0.03125, %v2086_v63 }
 0x9ff   : > { %v4166_v28 = vsub.f32 %v2072_v2, %v2100_v50 }
 0xa00   : > { %v2089_v12 = vpop.xlane.xlu0 %2088 }
 0xa01   : > { %v2101_v9 = vmul.f32 0.03125, %v2089_v12  ;;  %v2112_v55 = vmul.f32 %v4166_v28, %v4166_v28 }
 0xa03   : > { %v4170_v60 = vsub.f32 %v2073_v4, %v2101_v9  ;;  %v2122_v62 = vsel %vm487_vm1, %v2112_v55, 0.0  ;;  %v3529_v4 = vld [vmem:[%s3655_s17 + $0x8] sm:$0xff] }
 0xa04   : > { %2123 = vadd.xlane.f32.xlu1 %v2122_v62  ;;  %v2096_v46 = vpop.xlane.xlu0 %2095  ;;  %v2092_v49 = vpop.xlane.xlu1 %2091  ;;  %v3532_v62 = vld [vmem:[%s3655_s17 + $0x18] sm:$0xff] }
 0xa05   : > { %v2103_v29 = vmul.f32 0.03125, %v2096_v46  ;;  %v2102_v30 = vmul.f32 0.03125, %v2092_v49  ;;  %v2113_v32 = vmul.f32 %v4170_v60, %v4170_v60 }
 0xa07   : > { %v4175_v33 = vsub.f32 %v2075_v7, %v2103_v29  ;;  %v4177_v34 = vsub.f32 %v2074_v8, %v2102_v30  ;;  %v2125_v35 = vsel %vm487_vm1, %v2113_v32, 0.0 }
 0xa08   : > { %2126 = vadd.xlane.f32.xlu0 %v2125_v35  ;;  %v3533_v35 = vld [vmem:[%s3655_s17 + $0x28] sm:$0xf] }
 0xa09   : > { %v2115_v37 = vmul.f32 %v4175_v33, %v4175_v33  ;;  %v2114_v38 = vmul.f32 %v4177_v34, %v4177_v34 }
 0xa0b   : > { %v2131_v39 = vsel %vm2093_vm13, %v2115_v37, 0.0  ;;  %v2128_v56 = vsel %vm487_vm1, %v2114_v38, 0.0  ;;  %v3534_v38 = vld [vmem:[%s3655_s17 + $0x20] sm:$0xff] }
 0xa0c   : > { %2132 = vadd.xlane.f32.xlu0 %v2131_v39  ;;  %2129 = vadd.xlane.f32.xlu1 %v2128_v56 }
 0xa83   : > { %v2121_v40 = vpop.xlane.xlu0 %2120 }
 0xa84   : > { %v2135_v41 = vmul.f32 0.03125, %v2121_v40 }
 0xa85   : > { %v2118_v42 = vpop.xlane.xlu1 %2117 }
 0xa86   : > { %v2141_v31 = vadd.f32 1e-05, %v2135_v41  ;;  %v2134_v45 = vmul.f32 0.03125, %v2118_v42 }
 0xa88   : > { %3469 = vrsqrt.f32 %v2141_v31  ;;  %v2140_v22 = vadd.f32 1e-05, %v2134_v45 }
 0xa8a   : > { %3471 = vrsqrt.f32 %v2140_v22 }
 0xa8d   : > { %v2124_v36 = vpop.xlane.xlu1 %2123 }
 0xa8e   : > { %v2136_v47 = vmul.f32 0.03125, %v2124_v36 }
 0xa90   : > { %v2142_v20 = vadd.f32 1e-05, %v2136_v47 }
 0xa91   : > { %v2127_v48 = vpop.xlane.xlu0 %2126 }
 0xa92   : > { %3473 = vrsqrt.f32 %v2142_v20  ;;  %v2137_v25 = vmul.f32 0.03125, %v2127_v48 }
 0xa94   : > { %v2143_v43 = vadd.f32 1e-05, %v2137_v25 }
 0xa95   : > { %v3470_v17 = vpop.eup %3469  ;;  %v2133_v15 = vpop.xlane.xlu0 %2132 }
 0xa96   : > { %v2130_v18 = vpop.xlane.xlu1 %2129  ;;  %3475 = vrsqrt.f32 %v2143_v43  ;;  %v2139_v44 = vmul.f32 0.03125, %v2133_v15  ;;  %v2153_v16 = vmul.f32 %v3470_v17, %v2105_v13 }
 0xa97   : > { %v2138_v54 = vmul.f32 0.03125, %v2130_v18  ;;  %v3472_v51 = vpop.eup %3471 }
 0xa98   : > { %v2145_v53 = vadd.f32 1e-05, %v2139_v44  ;;  %v2165_v58 = vmul.f32 %v2967_v0, %v2153_v16  ;;  %v2152_v59 = vmul.f32 %v3472_v51, %v2104_v27 }
 0xa99   : > { %v2144_v57 = vadd.f32 1e-05, %v2138_v54 }
 0xa9a   : > { %3477 = vrsqrt.f32 %v2145_v53  ;;  %v2177_v2 = vadd.f32 %v2968_v52, %v2165_v58  ;;  %v2164_v3 = vmul.f32 %v2967_v0, %v2152_v59 }
 0xa9b   : > { %3479 = vrsqrt.f32 %v2144_v57 }
 0xa9c   : > { %v2183_v6 = vadd.f32 %v3529_v4, %v2177_v2  ;;  %v2176_v7 = vadd.f32 %v2968_v52, %v2164_v3 }
 0xa9e   : > { %v2193_v8 = vsel %vm487_vm1, %v2183_v6, 0.0  ;;  %v2182_v11 = vadd.f32 %v3530_v19, %v2176_v7  ;;  %v3363_v7 = vld [vmem:[%s4411_s7 + $0x8] sm:$0xff]  }
 0xa9f   : > { %v3474_v21 = vpop.eup %3473  ;;  %2194 = vadd.xlane.f32.xlu0 %v2193_v8  ;;  %3292 = vmatpush3.bf16.msra.mxu0 %v3363_v7  ;;  %v3364_v8 = vld [vmem:[%s4411_s7] sm:$0xff]  }
 0xaa0   : > { %v2190_v23 = vsel %vm487_vm1, %v2182_v11, 0.0  ;;  %v2154_v24 = vmul.f32 %v3474_v21, %v4166_v28  ;;  %3293 = vmatprep.subr.bf16.mxu0 %v3543_v1 }
 0xaa1   : > { %2191 = vadd.xlane.f32.xlu1 %v2190_v23 }
 0xaa2   : > { %v2166_v13 = vmul.f32 %v2967_v0, %v2154_v24 }
 0xaa3   : > { %v3476_v26 = vpop.eup %3475  ;;  %3294 = vmatpush3.bf16.msra.mxu0 %v3364_v8 }
 0xaa4   : > { %v2178_v27 = vadd.f32 %v2968_v52, %v2166_v13  ;;  %v2155_v14 = vmul.f32 %v3476_v26, %v4170_v60 }
 0xaa6   : > { %v2184_v5 = vadd.f32 %v3531_v10, %v2178_v27  ;;  %v2167_v61 = vmul.f32 %v2967_v0, %v2155_v14 }
 0xaa7   : > { %v3478_v63 = vpop.eup %3477 }
 0xaa8   : > { %v3480_v50 = vpop.eup %3479  ;;  %v2196_v12 = vsel %vm487_vm1, %v2184_v5, 0.0  ;;  %v2179_v9 = vadd.f32 %v2968_v52, %v2167_v61  ;;  %v2157_v55 = vmul.f32 %v3478_v63, %v4175_v33 }
 0xaa9   : > { %2197 = vadd.xlane.f32.xlu1 %v2196_v12  ;;  %v2156_v28 = vmul.f32 %v3480_v50, %v4177_v34  ;;  %v2969_v50 = vld [vmem:[%s4409_s5] ss:$0 sm:$0xff] }
 0xaaa   : > { %v2185_v46 = vadd.f32 %v3532_v62, %v2179_v9  ;;  %v2169_v49 = vmul.f32 %v2967_v0, %v2157_v55 }
 0xaab   : > { %v2168_v29 = vmul.f32 %v2967_v0, %v2156_v28 }
 0xaac   : > { %v2199_v60 = vsel %vm487_vm1, %v2185_v46, 0.0  ;;  %v2181_v30 = vadd.f32 %v2968_v52, %v2169_v49 }
 0xaad   : > { %2200 = vadd.xlane.f32.xlu0 %v2199_v60  ;;  %v2180_v32 = vadd.f32 %v2968_v52, %v2168_v29 }
 0xaae   : > { %v2187_v37 = vadd.f32 %v3533_v35, %v2181_v30 }
 0xaaf   : > { %v2186_v39 = vadd.f32 %v3534_v38, %v2180_v32  ;;  %v2970_v32 = vld [vmem:[%s4410_s6] ss:$0 sm:$0xff] }
 0xab0   : > { %v2205_v56 = vsel %vm2093_vm13, %v2187_v37, 0.0 }
 0xab1   : > { %2206 = vadd.xlane.f32.xlu0 %v2205_v56  ;;  %v2202_v33 = vsel %vm487_vm1, %v2186_v39, 0.0 }
 0xab2   : > { %2203 = vadd.xlane.f32.xlu1 %v2202_v33 }
 0xb28   : > { %v2195_v34 = vpop.xlane.xlu0 %2194 }
 0xb29   : > { %v2209_v40 = vmul.f32 0.03125, %v2195_v34 }
 0xb2a   : > { %v2192_v41 = vpop.xlane.xlu1 %2191 }
 0xb2b   : > { %v2215_v42 = vsub.f32 %v2183_v6, %v2209_v40  ;;  %v2208_v31 = vmul.f32 0.03125, %v2192_v41 }
 0xb2d   : > { %v2214_v45 = vsub.f32 %v2182_v11, %v2208_v31  ;;  %v2221_v22 = vmul.f32 %v2215_v42, %v2215_v42 }
 0xb2f   : > { %v2229_v36 = vsel %vm487_vm1, %v2221_v22, 0.0  ;;  %v2220_v47 = vmul.f32 %v2214_v45, %v2214_v45 }
 0xb30   : > { %2230 = vadd.xlane.f32.xlu0 %v2229_v36 }
 0xb31   : > { %v2226_v20 = vsel %vm487_vm1, %v2220_v47, 0.0 }
 0xb32   : > { %2227 = vadd.xlane.f32.xlu1 %v2226_v20  ;;  %v2198_v48 = vpop.xlane.xlu1 %2197 }
 0xb33   : > { %v2210_v25 = vmul.f32 0.03125, %v2198_v48 }
 0xb35   : > { %v4210_v43 = vsub.f32 %v2184_v5, %v2210_v25 }
 0xb36   : > { %v2201_v17 = vpop.xlane.xlu0 %2200 }
 0xb37   : > { %v2211_v15 = vmul.f32 0.03125, %v2201_v17  ;;  %v2222_v18 = vmul.f32 %v4210_v43, %v4210_v43 }
 0xb39   : > { %v4214_v0 = vsub.f32 %v2185_v46, %v2211_v15  ;;  %v2232_v44 = vsel %vm487_vm1, %v2222_v18, 0.0 }
 0xb3a   : > { %v2207_v54 = vpop.xlane.xlu0 %2206  ;;  %2233 = vadd.xlane.f32.xlu1 %v2232_v44  ;;  %v3366_v44 = vld [vmem:[%s4413_s9 + $0x30] sm:$0xff]  }
 0xb3b   : > { %v2213_v16 = vmul.f32 0.03125, %v2207_v54  ;;  %v2204_v51 = vpop.xlane.xlu1 %2203  ;;  %v2223_v52 = vmul.f32 %v4214_v0, %v4214_v0  ;;  %v3367_v54 = vld [vmem:[%s4413_s9 + $0x28] sm:$0xff]  }
 0xb3c   : > { %v2212_v53 = vmul.f32 0.03125, %v2204_v51  ;;  %v3369_v51 = vld [vmem:[%s4413_s9 + $0x18] sm:$0xff]  }
 0xb3d   : > { %v2219_v57 = vsub.f32 %v2187_v37, %v2213_v16  ;;  %v2235_v58 = vsel %vm487_vm1, %v2223_v52, 0.0  ;;  %v3368_v16 = vld [vmem:[%s4413_s9 + $0x20] sm:$0xff]   ;;  %v3370_v52 = vld [vmem:[%s4413_s9 + $0x10] sm:$0xff]  }
 0xb3e   : > { %v2218_v59 = vsub.f32 %v2186_v39, %v2212_v53  ;;  %2236 = vadd.xlane.f32.xlu0 %v2235_v58  ;;  %v3371_v53 = vld [vmem:[%s4413_s9 + $0x8] sm:$0xff]   ;;  %v2971_v58 = vld [vmem:[%s4412_s8] ss:$0 sm:$0xff] }
 0xb3f   : > { %v2225_v2 = vmul.f32 %v2219_v57, %v2219_v57 }
 0xb40   : > { %v2224_v3 = vmul.f32 %v2218_v59, %v2218_v59 }
 0xb41   : > { %v2241_v4 = vsel %vm2093_vm13, %v2225_v2, 0.0 }
 0xb42   : > { %2242 = vadd.xlane.f32.xlu0 %v2241_v4  ;;  %v2238_v6 = vsel %vm487_vm1, %v2224_v3, 0.0 }
 0xb43   : > { %2239 = vadd.xlane.f32.xlu1 %v2238_v6 }
 0xbb9   : > { %v2231_v19 = vpop.xlane.xlu0 %2230 }
 0xbba   : > { %v2245_v11 = vmul.f32 0.03125, %v2231_v19 }
 0xbbb   : > { %v2228_v21 = vpop.xlane.xlu1 %2227 }
 0xbbc   : > { %v2251_v23 = vadd.f32 1e-05, %v2245_v11  ;;  %v2244_v24 = vmul.f32 0.03125, %v2228_v21 }
 0xbbe   : > { %3481 = vrsqrt.f32 %v2251_v23  ;;  %v2250_v13 = vadd.f32 1e-05, %v2244_v24 }
 0xbc0   : > { %3483 = vrsqrt.f32 %v2250_v13 }
 0xbc3   : > { %v2234_v26 = vpop.xlane.xlu1 %2233 }
 0xbc4   : > { %v2246_v27 = vmul.f32 0.03125, %v2234_v26 }
 0xbc6   : > { %v2252_v14 = vadd.f32 1e-05, %v2246_v27 }
 0xbc7   : > { %v2237_v10 = vpop.xlane.xlu0 %2236 }
 0xbc8   : > { %3485 = vrsqrt.f32 %v2252_v14  ;;  %v2247_v5 = vmul.f32 0.03125, %v2237_v10 }
 0xbca   : > { %v2253_v61 = vadd.f32 1e-05, %v2247_v5 }
 0xbcb   : > { %v3482_v63 = vpop.eup %3481  ;;  %v2243_v12 = vpop.xlane.xlu0 %2242 }
 0xbcc   : > { %v2263_v9 = vmul.f32 %v3482_v63, %v2215_v42  ;;  %3487 = vrsqrt.f32 %v2253_v61  ;;  %v2249_v55 = vmul.f32 0.03125, %v2243_v12  ;;  %v2240_v28 = vpop.xlane.xlu1 %2239 }
 0xbcd   : > { %v3484_v62 = vpop.eup %3483  ;;  %v2248_v46 = vmul.f32 0.03125, %v2240_v28 }
 0xbce   : > { %v2275_v49 = vmul.f32 %v2969_v50, %v2263_v9  ;;  %v2262_v29 = vmul.f32 %v3484_v62, %v2214_v45  ;;  %v2255_v60 = vadd.f32 1e-05, %v2249_v55 }
 0xbcf   : > { %v2254_v30 = vadd.f32 1e-05, %v2248_v46 }
 0xbd0   : > { %v2274_v35 = vmul.f32 %v2969_v50, %v2262_v29  ;;  %3489 = vrsqrt.f32 %v2255_v60  ;;  %v4237_v38 = vadd.f32 %v2970_v32, %v2275_v49 }
 0xbd1   : > { %3491 = vrsqrt.f32 %v2254_v30 }
 0xbd2   : > { %v4235_v37 = vadd.f32 %v2970_v32, %v2274_v35 }
 0xbd4   : > { %v2292_v39 = vpack.c.bf16 %v4237_v38, %v4235_v37 }
 0xbd5   : > { %v3486_v56 = vpop.eup %3485 }
 0xbd6   : > { %3296 = vmatmul.mubr.msk.bf16.vlgmr.msra.gmra.mxu0 %vm487_vm1, %v2292_v39  ;;  %v2264_v33 = vmul.f32 %v3486_v56, %v4210_v43 }
 0xbd7   : > { %3299 = vmatprep.mubr.msk.bf16.mxu0 %vm3544_vm0, %v3543_v1 }
 0xbd8   : > { %v2276_v41 = vmul.f32 %v2969_v50, %v2264_v33 }
 0xbd9   : > { %v3488_v34 = vpop.eup %3487 }
 0xbda   : > { %v2265_v40 = vmul.f32 %v3488_v34, %v4214_v0  ;;  %v4246_v22 = vadd.f32 %v2970_v32, %v2276_v41  ;;  %v3365_v0 = vld [vmem:[%s4413_s9 + $0x38] sm:$0xff]  }
 0xbdb   : > { %3308 = vmatpush3.bf16.msra.mxu1 %v3365_v0 }
 0xbdc   : > { %v2277_v42 = vmul.f32 %v2969_v50, %v2265_v40  ;;  %3309 = vmatprep.subr.bf16.mxu1 %v3543_v1 }
 0xbdd   : > { %v3490_v31 = vpop.eup %3489 }
 0xbde   : > { %v3492_v45 = vpop.eup %3491  ;;  %v4248_v36 = vadd.f32 %v2970_v32, %v2277_v42  ;;  %v2267_v47 = vmul.f32 %v3490_v31, %v2219_v57  ;;  %v3372_v57 = vld [vmem:[%s4413_s9] sm:$0xff]  }
 0xbdf   : > { %v2266_v20 = vmul.f32 %v3492_v45, %v2218_v59  ;;  %3310 = vmatpush3.bf16.msra.mxu1 %v3366_v44 }
 0xbe0   : > { %v2293_v48 = vpack.c.bf16 %v4248_v36, %v4246_v22  ;;  %v2279_v25 = vmul.f32 %v2969_v50, %v2267_v47  ;;  %3311 = vmatprep.subr.bf16.mxu1 %v3543_v1 }
 0xbe1   : > { %v2278_v43 = vmul.f32 %v2969_v50, %v2266_v20 }
 0xbe2   : > { %3300 = vmatmul.mubr.msk.bf16.gmra.mxu0 %vm487_vm1, %v2293_v48  ;;  %v4257_v15 = vadd.f32 %v2970_v32, %v2279_v25 }
 0xbe3   : > { %3303 = vmatprep.mubr.msk.bf16.mxu0 %vm3544_vm0, %v3543_v1  ;;  %v4255_v17 = vadd.f32 %v2970_v32, %v2278_v43  ;;  %3312 = vmatpush3.bf16.msra.mxu1 %v3367_v54 }
 0xbe4   : > { %3313 = vmatprep.subr.bf16.mxu1 %v3543_v1 }
 0xbe5   : > { %v2294_v18 = vpack.c.bf16 %v4257_v15, %v4255_v17 }
 0xbe7   : > { %3314 = vmatpush3.bf16.msra.mxu1 %v3368_v16 }
 0xbe8   : > { %3315 = vmatprep.subr.bf16.mxu1 %v3543_v1 }
 0xbea   : > { %3304 = vmatmul.mubr.msk.bf16.gmra.mxu0 %vm487_vm1, %v2294_v18 }
 0xbeb   : > { %3316 = vmatpush3.bf16.msra.mxu1 %v3369_v51 }
 0xbec   : > { %3317 = vmatprep.subr.bf16.mxu1 %v3543_v1 }
 0xbef   : > { %3318 = vmatpush3.bf16.msra.mxu1 %v3370_v52 }
 0xbf0   : > { %3319 = vmatprep.subr.bf16.mxu1 %v3543_v1 }
 0xbf3   : > { %3320 = vmatpush3.bf16.msra.mxu1 %v3371_v53 }
 0xbf4   : > { %3321 = vmatprep.subr.bf16.mxu1 %v3543_v1 }
 0xbf7   : > { %3322 = vmatpush3.bf16.msra.mxu1 %v3372_v57 }
 0xc96   : > { %v2361_v59 = vpop.f32.mrf.mxu0 }
 0xc97   : > { %v4296_v2 = vadd.f32 %v2971_v58, %v2361_v59 }
 0xc98   : > { %v3297_v3 = vpop.f32.mrf.mxu0 }
 0xc99   : > { %v4299_v4 = vmul.f32 0.70710677, %v4296_v2 }
 0xc9a   : > { %v2364_v6 = vpop.f32.mrf.mxu0 }
 0xc9b   : > { %v2396_v7 = vand.u32 2147483647, %v4299_v4  ;;  %v4302_v8 = vadd.f32 %v2971_v58, %v2364_v6  ;;  %vm2516_vm14 = vcmp.ge.f32.partialorder %v4299_v4, 0.0 }
 0xc9c   : > { %v3298_v19 = vpop.f32.mrf.mxu0 }
 0xc9d   : > { %v2402_v11 = vmul.f32 0.3275911, %v2396_v7  ;;  %v4305_v21 = vmul.f32 0.70710677, %v4302_v8  ;;  %v2480_v63 = vsub.f32 0.0, %v2396_v7 }
 0xc9f   : > { %v2408_v23 = vadd.f32 1.0, %v2402_v11  ;;  %v2397_v24 = vand.u32 2147483647, %v4305_v21  ;;  %v2486_v46 = vmul.f32 %v2480_v63, %v2396_v7  ;;  %vm2517_vm15 = vcmp.ge.f32.partialorder %v4305_v21, 0.0 }
 0xca1   : > { %3493 = vrcp.f32 %v2408_v23  ;;  %v2403_v13 = vmul.f32 0.3275911, %v2397_v24  ;;  %v2481_v49 = vsub.f32 0.0, %v2397_v24  ;;  %v2492_v40 = vmul.f32 1.442695, %v2486_v46 }
 0xca2   : > { %v2369_v26 = vpop.f32.mrf.mxu0 }
 0xca3   : > { %v2409_v27 = vadd.f32 1.0, %v2403_v13  ;;  %v4308_v14 = vadd.f32 %v2971_v58, %v2369_v26  ;;  %v2487_v41 = vmul.f32 %v2481_v49, %v2397_v24 }
 0xca4   : > { %v3301_v10 = vpop.f32.mrf.mxu0 }
 0xca5   : > { %3495 = vrcp.f32 %v2409_v27  ;;  %v4311_v5 = vmul.f32 0.70710677, %v4308_v14  ;;  %v2494_v54 = vmul.f32 1.442695, %v2487_v41 }
 0xca6   : > { %v2372_v61 = vpop.f32.mrf.mxu0 }
 0xca7   : > { %v2398_v50 = vand.u32 2147483647, %v4311_v5  ;;  %v4314_v12 = vadd.f32 %v2971_v58, %v2372_v61  ;;  %vm2518_vm2 = vcmp.ge.f32.partialorder %v4311_v5, 0.0 }
 0xca8   : > { %v3302_v9 = vpop.f32.mrf.mxu0 }
 0xca9   : > { %v2404_v55 = vmul.f32 0.3275911, %v2398_v50  ;;  %v4317_v28 = vmul.f32 0.70710677, %v4314_v12  ;;  %v2482_v25 = vsub.f32 0.0, %v2398_v50 }
 0xcaa   : > { %v2377_v62 = vpop.f32.mrf.mxu0 }
 0xcab   : > { %v2410_v29 = vadd.f32 1.0, %v2404_v55  ;;  %v2399_v60 = vand.u32 2147483647, %v4317_v28  ;;  %v4320_v30 = vadd.f32 %v2971_v58, %v2377_v62  ;;  %v2488_v57 = vmul.f32 %v2482_v25, %v2398_v50 }
 0xcac   : > { %v3305_v32 = vpop.f32.mrf.mxu0  ;;  %vm2519_vm3 = vcmp.ge.f32.partialorder %v4317_v28, 0.0 }
 0xcad   : > { %3497 = vrcp.f32 %v2410_v29  ;;  %v2405_v35 = vmul.f32 0.3275911, %v2399_v60  ;;  %v4323_v56 = vmul.f32 0.70710677, %v4320_v30  ;;  %v2496_v24 = vmul.f32 1.442695, %v2488_v57 }
 0xcae   : > { %v3494_v39 = vpop.eup %3493  ;;  %v2380_v33 = vpop.f32.mrf.mxu0 }
 0xcaf   : > { %v2426_v34 = vmul.f32 1.0614054, %v3494_v39  ;;  %v2411_v42 = vadd.f32 1.0, %v2405_v35  ;;  %v2400_v31 = vand.u32 2147483647, %v4323_v56  ;;  %v4326_v45 = vadd.f32 %v2971_v58, %v2380_v33 }
 0xcb0   : > { %v3306_v47 = vpop.f32.mrf.mxu0  ;;  %v2483_v58 = vsub.f32 0.0, %v2399_v60  ;;  %vm2520_vm4 = vcmp.ge.f32.partialorder %v4323_v56, 0.0 }
 0xcb1   : > { %v2432_v20 = vadd.f32 -1.4531521, %v2426_v34  ;;  %3499 = vrcp.f32 %v2411_v42  ;;  %v2406_v43 = vmul.f32 0.3275911, %v2400_v31  ;;  %v4329_v18 = vmul.f32 0.70710677, %v4326_v45 }
 0xcb2   : > { %v3496_v48 = vpop.eup %3495  ;;  %3501 = vpow2.f32 %v2492_v40  ;;  %v2489_v13 = vmul.f32 %v2483_v58, %v2399_v60  ;;  %v2484_v61 = vsub.f32 0.0, %v2400_v31 }
 0xcb3   : > { %v2438_v0 = vmul.f32 %v3494_v39, %v2432_v20  ;;  %v2427_v44 = vmul.f32 1.0614054, %v3496_v48  ;;  %v2412_v16 = vadd.f32 1.0, %v2406_v43  ;;  %v2401_v51 = vand.u32 2147483647, %v4329_v18 }
 0xcb4   : > { %v2498_v62 = vmul.f32 1.442695, %v2489_v13  ;;  %v2490_v33 = vmul.f32 %v2484_v61, %v2400_v31  ;;  %v2384_v13 = vmul.f32 0.5, %v4296_v2  ;;  %vm2521_vm5 = vcmp.ge.f32.partialorder %v4329_v18, 0.0 }
 0xcb5   : > { %v2444_v52 = vadd.f32 1.4214138, %v2438_v0  ;;  %v2433_v53 = vadd.f32 -1.4531521, %v2427_v44  ;;  %3503 = vrcp.f32 %v2412_v16  ;;  %v2407_v59 = vmul.f32 0.3275911, %v2401_v51 }
 0xcb6   : > { %3505 = vpow2.f32 %v2494_v54  ;;  %v2485_v60 = vsub.f32 0.0, %v2401_v51  ;;  %v2500_v54 = vmul.f32 1.442695, %v2490_v33 }
 0xcb7   : > { %v2450_v3 = vmul.f32 %v3494_v39, %v2444_v52  ;;  %v2439_v6 = vmul.f32 %v3496_v48, %v2433_v53  ;;  %v2413_v7 = vadd.f32 1.0, %v2407_v59 }
 0xcb8   : > { %v2491_v16 = vmul.f32 %v2485_v60, %v2401_v51 }
 0xcb9   : > { %v2456_v19 = vadd.f32 -0.28449672, %v2450_v3  ;;  %v2445_v11 = vadd.f32 1.4214138, %v2439_v6  ;;  %3507 = vrcp.f32 %v2413_v7 }
 0xcba   : > { %v3498_v23 = vpop.eup %3497  ;;  %3509 = vpow2.f32 %v2496_v24  ;;  %v2502_v24 = vmul.f32 1.442695, %v2491_v16 }
 0xcbb   : > { %v2462_v26 = vmul.f32 %v3494_v39, %v2456_v19  ;;  %v2451_v27 = vmul.f32 %v3496_v48, %v2445_v11  ;;  %v2428_v10 = vmul.f32 1.0614054, %v3498_v23  ;;  %3511 = vpow2.f32 %v2498_v62 }
 0xcbc   : > { %3513 = vpow2.f32 %v2500_v54 }
 0xcbd   : > { %v2468_v63 = vadd.f32 0.2548296, %v2462_v26  ;;  %v2457_v9 = vadd.f32 -0.28449672, %v2451_v27  ;;  %v2434_v50 = vadd.f32 -1.4531521, %v2428_v10  ;;  %3515 = vpow2.f32 %v2502_v24 }
 0xcbe   : > { %v4332_v55 = vpop.eup %3499 }
 0xcbf   : > { %v2474_v46 = vmul.f32 %v3494_v39, %v2468_v63  ;;  %v2463_v49 = vmul.f32 %v3496_v48, %v2457_v9  ;;  %v2440_v29 = vmul.f32 %v3498_v23, %v2434_v50  ;;  %v2429_v32 = vmul.f32 1.0614054, %v4332_v55  ;;  %v3502_v35 = vpop.eup %3501 }
 0xcc0   : > { %v2385_v9 = vmul.f32 0.5, %v4302_v8 }
 0xcc1   : > { %v2504_v34 = vmul.f32 %v3502_v35, %v2474_v46  ;;  %v2469_v40 = vadd.f32 0.2548296, %v2463_v49  ;;  %v2446_v41 = vadd.f32 1.4214138, %v2440_v29  ;;  %v2435_v42 = vadd.f32 -1.4531521, %v2429_v32 }
 0xcc2   : > { %v3504_v47 = vpop.eup %3503 }
 0xcc3   : > { %v2510_v20 = vsub.f32 1.0, %v2504_v34  ;;  %v2475_v25 = vmul.f32 %v3496_v48, %v2469_v40  ;;  %v2452_v43 = vmul.f32 %v3498_v23, %v2446_v41  ;;  %v2441_v0 = vmul.f32 %v4332_v55, %v2435_v42  ;;  %v3506_v44 = vpop.eup %3505 }
 0xcc4   : > { %v2430_v39 = vmul.f32 1.0614054, %v3504_v47 }
 0xcc5   : > { %v2522_v52 = vsub.f32 0.0, %v2510_v20  ;;  %v2505_v53 = vmul.f32 %v3506_v44, %v2475_v25  ;;  %v2458_v57 = vadd.f32 -0.28449672, %v2452_v43  ;;  %v2447_v31 = vadd.f32 1.4214138, %v2441_v0 }
 0xcc6   : > { %v2436_v58 = vadd.f32 -1.4531521, %v2430_v39  ;;  %v3508_v59 = vpop.eup %3507 }
 0xcc7   : > { %v2528_v3 = vsel %vm2516_vm14, %v2510_v20, %v2522_v52  ;;  %v2511_v6 = vsub.f32 1.0, %v2505_v53  ;;  %v2464_v7 = vmul.f32 %v3498_v23, %v2458_v57  ;;  %v2453_v48 = vmul.f32 %v4332_v55, %v2447_v31  ;;  %v3510_v63 = vpop.eup %3509 }
 0xcc8   : > { %v2442_v19 = vmul.f32 %v3504_v47, %v2436_v58  ;;  %v2431_v11 = vmul.f32 1.0614054, %v3508_v59  ;;  %v2534_v10 = vadd.f32 1.0, %v2528_v3  ;;  %v3512_v21 = vpop.eup %3511  ;;  %v2386_v3 = vmul.f32 0.5, %v4308_v14 }
 0xcc9   : > { %v2523_v51 = vsub.f32 0.0, %v2511_v6  ;;  %v2470_v26 = vadd.f32 0.2548296, %v2464_v7  ;;  %v2459_v27 = vadd.f32 -0.28449672, %v2453_v48  ;;  %v3514_v53 = vpop.eup %3513 }
 0xcca   : > { %v2448_v4 = vadd.f32 1.4214138, %v2442_v19  ;;  %v2437_v61 = vadd.f32 -1.4531521, %v2431_v11  ;;  %v2540_v33 = vmul.f32 %v2534_v10, %v2384_v13  ;;  %v3516_v11 = vpop.eup %3515 }
 0xccb   : > { %v2529_v50 = vsel %vm2517_vm15, %v2511_v6, %v2523_v51  ;;  %v2476_v62 = vmul.f32 %v3498_v23, %v2470_v26  ;;  %v2465_v46 = vmul.f32 %v4332_v55, %v2459_v27  ;;  %v2387_v6 = vmul.f32 0.5, %v4314_v12 }
 0xccc   : > { %v2535_v49 = vadd.f32 1.0, %v2529_v50  ;;  %v2454_v29 = vmul.f32 %v3504_v47, %v2448_v4  ;;  %v2443_v32 = vmul.f32 %v3508_v59, %v2437_v61  ;;  %v2388_v12 = vmul.f32 0.5, %v4320_v30  ;;  %v2977_v50 = vld [vmem:[%s4414_s10] ss:$0 sm:$0xff] }
 0xccd   : > { %v2506_v2 = vmul.f32 %v3510_v63, %v2476_v62  ;;  %v2471_v35 = vadd.f32 0.2548296, %v2465_v46 }
 0xcce   : > { %v2541_v60 = vmul.f32 %v2535_v49, %v2385_v9  ;;  %v2460_v34 = vadd.f32 -0.28449672, %v2454_v29  ;;  %v2449_v40 = vadd.f32 1.4214138, %v2443_v32 }
 0xccf   : > { %v2512_v41 = vsub.f32 1.0, %v2506_v2  ;;  %v2477_v42 = vmul.f32 %v4332_v55, %v2471_v35 }
 0xcd0   : > { %v2546_v20 = vpack.c.bf16 %v2541_v60, %v2540_v33  ;;  %v2466_v8 = vmul.f32 %v3504_v47, %v2460_v34  ;;  %v2455_v25 = vmul.f32 %v3508_v59, %v2449_v40 }
 0xcd1   : > { %v2524_v23 = vsub.f32 0.0, %v2512_v41  ;;  %v2507_v43 = vmul.f32 %v3512_v21, %v2477_v42 }
 0xcd2   : > { %v2472_v0 = vadd.f32 0.2548296, %v2466_v8  ;;  %v2461_v44 = vadd.f32 -0.28449672, %v2455_v25  ;;  %3324 = vmatmul.mubr.bf16.vlgmr.msra.gmra.mxu1 %v2546_v20 }
 0xcd3   : > { %v2530_v39 = vsel %vm2518_vm2, %v2512_v41, %v2524_v23  ;;  %v2513_v54 = vsub.f32 1.0, %v2507_v43  ;;  %3327 = vmatprep.mubr.msk.bf16.mxu1 %vm3544_vm0, %v3543_v1 }
 0xcd4   : > { %v2478_v16 = vmul.f32 %v3504_v47, %v2472_v0  ;;  %v2467_v52 = vmul.f32 %v3508_v59, %v2461_v44  ;;  %v2536_v55 = vadd.f32 1.0, %v2530_v39 }
 0xcd5   : > { %v2525_v57 = vsub.f32 0.0, %v2513_v54 }
 0xcd6   : > { %v2508_v31 = vmul.f32 %v3514_v53, %v2478_v16  ;;  %v2473_v58 = vadd.f32 0.2548296, %v2467_v52  ;;  %v2542_v24 = vmul.f32 %v2536_v55, %v2386_v3 }
 0xcd7   : > { %v2531_v5 = vsel %vm2519_vm3, %v2513_v54, %v2525_v57 }
 0xcd8   : > { %v2537_v7 = vadd.f32 1.0, %v2531_v5  ;;  %v2514_v48 = vsub.f32 1.0, %v2508_v31  ;;  %v2479_v19 = vmul.f32 %v3508_v59, %v2473_v58  ;;  %v2389_v59 = vmul.f32 0.5, %v4326_v45 }
 0xcda   : > { %v2543_v13 = vmul.f32 %v2537_v7, %v2387_v6  ;;  %v2526_v47 = vsub.f32 0.0, %v2514_v48  ;;  %v2509_v51 = vmul.f32 %v3516_v11, %v2479_v19 }
 0xcdc   : > { %v2532_v26 = vsel %vm2520_vm4, %v2514_v48, %v2526_v47  ;;  %v2515_v27 = vsub.f32 1.0, %v2509_v51  ;;  %v2547_v28 = vpack.c.bf16 %v2543_v13, %v2542_v24 }
 0xcdd   : > { %v2538_v4 = vadd.f32 1.0, %v2532_v26 }
 0xcde   : > { %v2527_v10 = vsub.f32 0.0, %v2515_v27  ;;  %3328 = vmatmul.mubr.bf16.gmra.mxu1 %v2547_v28 }
 0xcdf   : > { %3331 = vmatprep.mubr.msk.bf16.mxu1 %vm3544_vm0, %v3543_v1  ;;  %v2544_v63 = vmul.f32 %v2538_v4, %v2388_v12 }
 0xce0   : > { %v2533_v14 = vsel %vm2521_vm5, %v2515_v27, %v2527_v10 }
 0xce1   : > { %v2539_v61 = vadd.f32 1.0, %v2533_v14 }
 0xce3   : > { %v2545_v9 = vmul.f32 %v2539_v61, %v2389_v59 }
 0xce5   : > { %v2548_v56 = vpack.c.bf16 %v2545_v9, %v2544_v63 }
 0xce7   : > { %3332 = vmatmul.mubr.bf16.gmra.mxu1 %v2548_v56 }
 0xd92   : > { %v2654_v62 = vpop.f32.mrf.mxu1 }
 0xd93   : > { %v2655_v46 = vadd.f32 %v2977_v50, %v2654_v62 }
 0xd94   : > { %v3325_v18 = vpop.f32.mrf.mxu1 }
 0xd95   : > { %v2677_v49 = vadd.f32 %v2655_v46, %v4235_v37 }
 0xd96   : > { %v2657_v1 = vpop.f32.mrf.mxu1 }
 0xd97   : > { %v2658_v29 = vadd.f32 %v2977_v50, %v2657_v1  ;;  %v2685_v30 = vsel %vm487_vm1, %v2677_v49, 0.0 }
 0xd98   : > { %2686 = vadd.xlane.f32.xlu1 %v2685_v30  ;;  %v3326_v45 = vpop.f32.mrf.mxu1 }
 0xd99   : > { %v2678_v32 = vadd.f32 %v2658_v29, %v4237_v38 }
 0xd9b   : > { %v2688_v2 = vsel %vm487_vm1, %v2678_v32, 0.0 }
 0xd9c   : > { %2689 = vadd.xlane.f32.xlu0 %v2688_v2 }
 0xd9e   : > { %v2662_v35 = vpop.f32.mrf.mxu1 }
 0xd9f   : > { %v2663_v33 = vadd.f32 %v2977_v50, %v2662_v35 }
 0xda0   : > { %v3329_v60 = vpop.f32.mrf.mxu1 }
 0xda1   : > { %v2679_v34 = vadd.f32 %v2663_v33, %v4246_v22  ;;  %v2987_v33 = vld [vmem:[%s4416_s12] ss:$0 sm:$0xff] }
 0xda2   : > { %v2665_v40 = vpop.f32.mrf.mxu1 }
 0xda3   : > { %v2666_v21 = vadd.f32 %v2977_v50, %v2665_v40  ;;  %v2691_v37 = vsel %vm487_vm1, %v2679_v34, 0.0 }
 0xda4   : > { %2692 = vadd.xlane.f32.xlu1 %v2691_v37  ;;  %v3330_v41 = vpop.f32.mrf.mxu1 }
 0xda5   : > { %v2680_v42 = vadd.f32 %v2666_v21, %v4248_v36 }
 0xda7   : > { %v2670_v20 = vpop.f32.mrf.mxu1  ;;  %v2694_v8 = vsel %vm487_vm1, %v2680_v42, 0.0 }
 0xda8   : > { %v2671_v38 = vadd.f32 %v2977_v50, %v2670_v20  ;;  %2695 = vadd.xlane.f32.xlu0 %v2694_v8 }
 0xda9   : > { %v3333_v25 = vpop.f32.mrf.mxu1 }
 0xdaa   : > { %v2681_v23 = vadd.f32 %v2671_v38, %v4255_v17 }
 0xdab   : > { %v2673_v43 = vpop.f32.mrf.mxu1 }
 0xdac   : > { %v2674_v0 = vadd.f32 %v2977_v50, %v2673_v43  ;;  %v2697_v22 = vsel %vm487_vm1, %v2681_v23, 0.0 }
 0xdad   : > { %2698 = vadd.xlane.f32.xlu1 %v2697_v22  ;;  %v3334_v44 = vpop.f32.mrf.mxu1 }
 0xdae   : > { %v2682_v39 = vadd.f32 %v2674_v0, %v4257_v15 }
 0xdb0   : > { %v2700_v54 = vsel %vm2093_vm13, %v2682_v39, 0.0 }
 0xdb1   : > { %2701 = vadd.xlane.f32.xlu0 %v2700_v54 }
 0xe21   : > { %v2687_v36 = vpop.xlane.xlu1 %2686 }
 0xe22   : > { %v2703_v16 = vmul.f32 0.03125, %v2687_v36 }
 0xe24   : > { %v2709_v52 = vsub.f32 %v2677_v49, %v2703_v16 }
 0xe25   : > { %v2690_v53 = vpop.xlane.xlu0 %2689 }
 0xe26   : > { %v2704_v57 = vmul.f32 0.03125, %v2690_v53  ;;  %v2715_v55 = vmul.f32 %v2709_v52, %v2709_v52 }
 0xe28   : > { %v2710_v31 = vsub.f32 %v2678_v32, %v2704_v57  ;;  %v2721_v17 = vsel %vm487_vm1, %v2715_v55, 0.0  ;;  %v2986_v32 = vld [vmem:[%s4415_s11] ss:$0 sm:$0xff] }
 0xe29   : > { %2722 = vadd.xlane.f32.xlu1 %v2721_v17 }
 0xe2a   : > { %v2716_v58 = vmul.f32 %v2710_v31, %v2710_v31 }
 0xe2c   : > { %v2724_v3 = vsel %vm487_vm1, %v2716_v58, 0.0 }
 0xe2d   : > { %2725 = vadd.xlane.f32.xlu0 %v2724_v3  ;;  %v2693_v5 = vpop.xlane.xlu1 %2692 }
 0xe2e   : > { %v2705_v6 = vmul.f32 0.03125, %v2693_v5 }
 0xe30   : > { %v2711_v15 = vsub.f32 %v2679_v34, %v2705_v6 }
 0xe31   : > { %v2696_v7 = vpop.xlane.xlu0 %2695 }
 0xe32   : > { %v2706_v48 = vmul.f32 0.03125, %v2696_v7  ;;  %v2717_v19 = vmul.f32 %v2711_v15, %v2711_v15 }
 0xe34   : > { %v2712_v11 = vsub.f32 %v2680_v42, %v2706_v48  ;;  %v2727_v24 = vsel %vm487_vm1, %v2717_v19, 0.0 }
 0xe35   : > { %2728 = vadd.xlane.f32.xlu1 %v2727_v24 }
 0xe36   : > { %v2699_v13 = vpop.xlane.xlu1 %2698  ;;  %v2718_v47 = vmul.f32 %v2712_v11, %v2712_v11 }
 0xe37   : > { %v2707_v51 = vmul.f32 0.03125, %v2699_v13 }
 0xe38   : > { %v2730_v26 = vsel %vm487_vm1, %v2718_v47, 0.0 }
 0xe39   : > { %v2713_v27 = vsub.f32 %v2681_v23, %v2707_v51  ;;  %2731 = vadd.xlane.f32.xlu0 %v2730_v26 }
 0xe3a   : > { %v2702_v28 = vpop.xlane.xlu0 %2701 }
 0xe3b   : > { %v2708_v10 = vmul.f32 0.03125, %v2702_v28  ;;  %v2719_v4 = vmul.f32 %v2713_v27, %v2713_v27 }
 0xe3d   : > { %v2714_v14 = vsub.f32 %v2682_v39, %v2708_v10  ;;  %v2733_v12 = vsel %vm487_vm1, %v2719_v4, 0.0 }
 0xe3e   : > { %2734 = vadd.xlane.f32.xlu1 %v2733_v12 }
 0xe3f   : > { %v2720_v59 = vmul.f32 %v2714_v14, %v2714_v14 }
 0xe41   : > { %v2736_v61 = vsel %vm2093_vm13, %v2720_v59, 0.0 }
 0xe42   : > { %2737 = vadd.xlane.f32.xlu0 %v2736_v61 }
 0xeb2   : > { %v2723_v63 = vpop.xlane.xlu1 %2722 }
 0xeb3   : > { %v2739_v9 = vmul.f32 0.03125, %v2723_v63 }
 0xeb5   : > { %v2745_v56 = vadd.f32 1e-05, %v2739_v9 }
 0xeb6   : > { %v2726_v50 = vpop.xlane.xlu0 %2725 }
 0xeb7   : > { %3517 = vrsqrt.f32 %v2745_v56  ;;  %v2740_v62 = vmul.f32 0.03125, %v2726_v50 }
 0xeb9   : > { %v2746_v46 = vadd.f32 1e-05, %v2740_v62 }
 0xebb   : > { %3519 = vrsqrt.f32 %v2746_v46 }
 0xebe   : > { %v2729_v18 = vpop.xlane.xlu1 %2728 }
 0xebf   : > { %v2741_v49 = vmul.f32 0.03125, %v2729_v18 }
 0xec1   : > { %v2747_v1 = vadd.f32 1e-05, %v2741_v49 }
 0xec2   : > { %v2732_v29 = vpop.xlane.xlu0 %2731 }
 0xec3   : > { %3521 = vrsqrt.f32 %v2747_v1  ;;  %v2742_v30 = vmul.f32 0.03125, %v2732_v29 }
 0xec4   : > { %v3518_v45 = vpop.eup %3517 }
 0xec5   : > { %v2757_v2 = vmul.f32 %v3518_v45, %v2709_v52  ;;  %v2748_v35 = vadd.f32 1e-05, %v2742_v30 }
 0xec7   : > { %v2769_v60 = vmul.f32 %v2986_v32, %v2757_v2  ;;  %3523 = vrsqrt.f32 %v2748_v35  ;;  %v2735_v34 = vpop.xlane.xlu1 %2734 }
 0xec8   : > { %v3520_v40 = vpop.eup %3519  ;;  %v2743_v21 = vmul.f32 0.03125, %v2735_v34 }
 0xec9   : > { %v2781_v37 = vadd.f32 %v2987_v33, %v2769_v60  ;;  %v2758_v41 = vmul.f32 %v3520_v40, %v2710_v31 }
 0xeca   : > { %v2749_v42 = vadd.f32 1e-05, %v2743_v21 }
 0xecb   : > { %2787 = vst.msk [vmem:[%s4387_s19] sm:$0xff] %vm487_vm1, %v2781_v37  ;;  %v2770_v20 = vmul.f32 %v2986_v32, %v2758_v41  ;;  %v2738_v8 = vpop.xlane.xlu0 %2737 }
 0xecc   : > { %3525 = vrsqrt.f32 %v2749_v42  ;;  %v2744_v38 = vmul.f32 0.03125, %v2738_v8 }
 0xecd   : > { %v2782_v25 = vadd.f32 %v2987_v33, %v2770_v20 }
 0xece   : > { %v2750_v23 = vadd.f32 1e-05, %v2744_v38 }
 0xecf   : > { %2788 = vst.msk [vmem:[%s4387_s19 + $0x8] sm:$0xff] %vm487_vm1, %v2782_v25 }
 0xed0   : > { %v3522_v43 = vpop.eup %3521  ;;  %3527 = vrsqrt.f32 %v2750_v23 }
 0xed1   : > { %v2759_v0 = vmul.f32 %v3522_v43, %v2711_v15 }
 0xed3   : > { %v2771_v22 = vmul.f32 %v2986_v32, %v2759_v0 }
 0xed4   : > { %v3524_v44 = vpop.eup %3523 }
 0xed5   : > { %v2783_v39 = vadd.f32 %v2987_v33, %v2771_v22  ;;  %v2760_v54 = vmul.f32 %v3524_v44, %v2712_v11 }
 0xed7   : > { %2789 = vst.msk [vmem:[%s4387_s19 + $0x10] sm:$0xff] %vm487_vm1, %v2783_v39  ;;  %v2772_v36 = vmul.f32 %v2986_v32, %v2760_v54 }
 0xed9   : > { %v3526_v16 = vpop.eup %3525  ;;  %v2784_v52 = vadd.f32 %v2987_v33, %v2772_v36 }
 0xeda   : > { %v2761_v53 = vmul.f32 %v3526_v16, %v2713_v27 }
 0xedb   : > { %2790 = vst.msk [vmem:[%s4387_s19 + $0x18] sm:$0xff] %vm487_vm1, %v2784_v52 }
 0xedc   : > { %v2773_v57 = vmul.f32 %v2986_v32, %v2761_v53 }
 0xedd   : > { %v3528_v55 = vpop.eup %3527 }
 0xede   : > { %v2785_v31 = vadd.f32 %v2987_v33, %v2773_v57  ;;  %v2762_v17 = vmul.f32 %v3528_v55, %v2714_v14 }
 0xee0   : > { %2791 = vst.msk [vmem:[%s4387_s19 + $0x20] sm:$0xff] %vm487_vm1, %v2785_v31  ;;  %v2774_v58 = vmul.f32 %v2986_v32, %v2762_v17 }
 0xee2   : > { %v2786_v3 = vadd.f32 %v2987_v33, %v2774_v58 }
 0xee4   : > { %2792 = vst.msk [vmem:[%s4387_s19 + $0x28] sm:$0xf] %vm2093_vm13, %v2786_v3 }
 0xee5 PF: > { %s23_s25 = sadd.s32 1, %s3541_s25  }
 0xee6   : > { %p20_p4 = scmp.ge.s32.totalorder %s23_s25, 4  }
 0xee8   :  { %22 = sbr.rel (!%p20_p4) target bundleno = 1 (0x1), region = 108 }

</bundles_post_ra>
